<compile_context>
chip_gen: v5e
topology: v5e:2x2
jax: 0.10.0
libtpu: 0.0.40
codegen_flags: <defaults>
</compile_context>

<pallas_src>
import math

import jax
import jax.numpy as jnp
from jax import lax
from jax.experimental import pallas as pl
from jax.experimental.pallas import tpu as pltpu

# ---------------- model hyper-parameters (small, BERT-like) ----------------
B = 2           # batch
S = 8           # sequence length
H = 32          # hidden size (stands in for 768)
NH = 2          # attention heads
HD = H // NH    # head dim
I = 64          # FFN intermediate size
VOCAB = 32
TYPE_VOCAB = 2
N_LAYERS = 2
LN_EPS = 1e-12
ATTN_SCALE = 1.0 / math.sqrt(HD)


# ----------------------------- in-kernel helpers -----------------------------
def _mm(a, b):
    """MXU matmul with f32 accumulation.  Operands are expected to be bf16."""
    return jnp.dot(a, b, preferred_element_type=jnp.float32)


def _mm_bt(a, b):
    """a @ b.T with f32 accumulation (contract last dims, no explicit transpose)."""
    return lax.dot_general(a, b, (((1,), (1,)), ((), ())),
                           preferred_element_type=jnp.float32)


def _layernorm(x, g, b):
    mu = jnp.mean(x, axis=-1, keepdims=True)
    var = jnp.mean(jnp.square(x - mu), axis=-1, keepdims=True)
    return (x - mu) * lax.rsqrt(var + LN_EPS) * g + b


# --------------------------------- kernel ------------------------------------
def _encoder_kernel(emb_ref, mask_ref, sel_ref, emb_g_ref, emb_b_ref,
                    wqkv_ref, bqkv_ref, wo_ref, bo_ref,
                    wi_ref, bi_ref, wf_ref, bf_ref,
                    ln1_g_ref, ln1_b_ref, ln2_g_ref, ln2_b_ref,
                    out_ref, h_f32, h_bf16):
    """One (batch example, layer) grid step.

    The hidden state for the current example is carried across the layer axis
    in VMEM scratch: h_f32 for residuals / LayerNorm statistics, h_bf16 as the
    single pre-cast MXU operand.  Layer 0 seeds it from the embedding
    LayerNorm; the last layer also performs masked mean-pool + L2 normalize.
    """
    l = pl.program_id(1)

    # ----- layer 0: embedding LayerNorm seeds the carried hidden state -----
    @pl.when(l == 0)
    def _():
        h0 = _layernorm(emb_ref[0], emb_g_ref[...], emb_b_ref[...])     # [S, H]
        h_f32[...] = h0
        h_bf16[...] = h0.astype(jnp.bfloat16)

    # Additive attention bias from the per-example key-valid vector (O(S) VPU).
    attn_bias = jnp.where(mask_ref[0] > 0.5, 0.0, -1e9)                 # [1, S]

    h = h_f32[...]                                                      # [S, H] f32
    h_bf = h_bf16[...]                                                  # [S, H] bf16

    # Per-layer weight slabs (streamed by BlockSpec, one layer per step).
    wqkv = wqkv_ref[0]                                                  # [H, 3H] bf16
    wo = wo_ref[0]                                                      # [H, H]  bf16
    wi = wi_ref[0]                                                      # [H, I]  bf16
    wf = wf_ref[0]                                                      # [I, H]  bf16

    # Fused QKV projection; columns are head-interleaved [Q_h | K_h | V_h].
    qkv = _mm(h_bf, wqkv) + bqkv_ref[0]                                 # [S, 3H] f32
    qkv_bf = qkv.astype(jnp.bfloat16)                                   # single cast, reused

    attn_acc = jnp.zeros((S, H), jnp.float32)
    for hd_i in range(NH):
        base = hd_i * 3 * HD                                            # contiguous head block
        q_h = qkv_bf[:, base:base + HD]                                 # [S, HD]
        k_h = qkv_bf[:, base + HD:base + 2 * HD]
        v_h = qkv_bf[:, base + 2 * HD:base + 3 * HD]
        s = _mm_bt(q_h, k_h) * ATTN_SCALE + attn_bias                   # [S, S] f32
        s_max = jnp.max(s, axis=-1, keepdims=True)
        p = jnp.exp(s - s_max)
        p = p * pl.reciprocal(jnp.sum(p, axis=-1, keepdims=True), approx=True)
        ctx_h = _mm(p.astype(jnp.bfloat16), v_h)                        # [S, HD] f32
        # Per-head accumulation into the output projection: no lane-concat of
        # heads, just a static sublane row-slice of W_o + an MXU accumulate.
        attn_acc = attn_acc + _mm(ctx_h.astype(jnp.bfloat16),
                                  wo[hd_i * HD:(hd_i + 1) * HD, :])
    attn_out = attn_acc + bo_ref[0]

    h1 = _layernorm(attn_out + h, ln1_g_ref[0], ln1_b_ref[0])
    h1_bf = h1.astype(jnp.bfloat16)

    # TODO(synk): HF BERT uses exact erf-GELU; tanh approximation kept for guaranteed Mosaic lowering.
    inter = jax.nn.gelu(_mm(h1_bf, wi) + bi_ref[0], approximate=True)
    ffn = _mm(inter.astype(jnp.bfloat16), wf) + bf_ref[0]
    h2 = _layernorm(ffn + h1, ln2_g_ref[0], ln2_b_ref[0])

    h_f32[...] = h2
    h_bf16[...] = h2.astype(jnp.bfloat16)

    # ----- last layer: masked mean-pool (exact f32 VPU sum) + L2 normalize -----
    @pl.when(l == pl.num_programs(1) - 1)
    def _():
        sel = sel_ref[0]                                                # [S, 1] 0/1
        summed = jnp.sum(h2 * sel, axis=0, keepdims=True)               # [1, H] f32
        cnt = jnp.maximum(jnp.sum(sel, axis=0, keepdims=True), 1.0)     # [1, 1]
        mean = summed * pl.reciprocal(cnt, approx=True)                 # scale cancels in L2 norm
        nrm_sq = jnp.sum(mean * mean, axis=-1, keepdims=True)
        out_ref[0] = mean * lax.rsqrt(jnp.maximum(nrm_sq, 1e-24))       # F.normalize(p=2, dim=1)


# ----------------------------- parameter init --------------------------------
def init_params(key):
    def dense(k, din, dout):
        return (0.02 * jax.random.normal(k, (din, dout), jnp.float32),
                jnp.zeros((1, dout), jnp.float32))

    keys = jax.random.split(key, 3 + N_LAYERS)
    params = {
        "word_emb": 0.02 * jax.random.normal(keys[0], (VOCAB, H), jnp.float32),
        "pos_emb": 0.02 * jax.random.normal(keys[1], (S, H), jnp.float32),
        "type_emb": 0.02 * jax.random.normal(keys[2], (TYPE_VOCAB, H), jnp.float32),
        "emb_ln_g": jnp.ones((1, H), jnp.float32),
        "emb_ln_b": jnp.zeros((1, H), jnp.float32),
        "layers": [],
    }
    for li in range(N_LAYERS):
        lk = jax.random.split(keys[3 + li], 6)
        wq, bq = dense(lk[0], H, H)
        wk, bk = dense(lk[1], H, H)
        wv, bv = dense(lk[2], H, H)
        wo, bo = dense(lk[3], H, H)
        wi, bi = dense(lk[4], H, I)
        wf, bf = dense(lk[5], I, H)
        params["layers"].append({
            "wq": wq, "bq": bq, "wk": wk, "bk": bk, "wv": wv, "bv": bv,
            "wo": wo, "bo": bo, "wi": wi, "bi": bi, "wf": wf, "bf": bf,
            "ln1_g": jnp.ones((1, H), jnp.float32),
            "ln1_b": jnp.zeros((1, H), jnp.float32),
            "ln2_g": jnp.ones((1, H), jnp.float32),
            "ln2_b": jnp.zeros((1, H), jnp.float32),
        })
    return params


def _stack(params, name, dtype=None):
    w = jnp.stack([lyr[name] for lyr in params["layers"]], axis=0)
    return w.astype(dtype) if dtype is not None else w


def _interleave_qkv(q, k, v):
    """Column-interleave so each head's [Q_h | K_h | V_h] block is contiguous."""
    parts = []
    for hd_i in range(NH):
        sl = slice(hd_i * HD, (hd_i + 1) * HD)
        parts += [q[:, sl], k[:, sl], v[:, sl]]
    return jnp.concatenate(parts, axis=-1)


# -------------------------------- forward ------------------------------------
def context_encoder_forward(params, input_ids, attention_mask, token_type_ids, sel_mask):
    attention_mask = attention_mask.astype(jnp.float32)

    # Embedding gathers (plain JAX glue) -> summed embeddings [B, S, H].
    we = jnp.take(params["word_emb"], input_ids, axis=0)                       # [B,S,H]
    pe = jnp.broadcast_to(params["pos_emb"][None, :S, :], (B, S, H))
    te = jnp.take(params["type_emb"], token_type_ids, axis=0)
    emb = (we + pe + te).astype(jnp.float32)

    mask = attention_mask.reshape(B, 1, S)                                     # key-valid per example
    sel = sel_mask.astype(jnp.float32).reshape(B, S, 1)                        # pooling selection

    # Per-layer weight slabs (streamed one layer per grid step). Matmul
    # operands pre-cast to bf16 (MXU-native); biases / LN params stay f32.
    wqkv = jnp.stack([_interleave_qkv(l["wq"], l["wk"], l["wv"])
                      for l in params["layers"]]).astype(jnp.bfloat16)         # [L, H, 3H]
    bqkv = jnp.stack([_interleave_qkv(l["bq"], l["bk"], l["bv"])
                      for l in params["layers"]])                              # [L, 1, 3H]
    wo, bo = _stack(params, "wo", jnp.bfloat16), _stack(params, "bo")
    wi, bi = _stack(params, "wi", jnp.bfloat16), _stack(params, "bi")
    wf, bf = _stack(params, "wf", jnp.bfloat16), _stack(params, "bf")
    ln1_g, ln1_b = _stack(params, "ln1_g"), _stack(params, "ln1_b")
    ln2_g, ln2_b = _stack(params, "ln2_g"), _stack(params, "ln2_b")

    per_batch3 = lambda shape: pl.BlockSpec(shape, lambda b, l: (b, 0, 0))
    per_layer3 = lambda shape: pl.BlockSpec(shape, lambda b, l: (l, 0, 0))
    shared2d = pl.BlockSpec((1, H), lambda b, l: (0, 0))

    grid_spec = pltpu.PrefetchScalarGridSpec(
        num_scalar_prefetch=0,
        grid=(B, N_LAYERS),                         # batch parallel, layers serial
        in_specs=[
            per_batch3((1, S, H)),                  # emb
            per_batch3((1, 1, S)),                  # attention mask (key-valid)
            per_batch3((1, S, 1)),                  # pooling selection mask
            shared2d, shared2d,                     # embedding LN gamma / beta
            per_layer3((1, H, 3 * H)),              # wqkv (interleaved)
            per_layer3((1, 1, 3 * H)),              # bqkv
            per_layer3((1, H, H)),                  # wo
            per_layer3((1, 1, H)),                  # bo
            per_layer3((1, H, I)),                  # wi
            per_layer3((1, 1, I)),                  # bi
            per_layer3((1, I, H)),                  # wf
            per_layer3((1, 1, H)),                  # bf
            per_layer3((1, 1, H)),                  # ln1_g
            per_layer3((1, 1, H)),                  # ln1_b
            per_layer3((1, 1, H)),                  # ln2_g
            per_layer3((1, 1, H)),                  # ln2_b
        ],
        out_specs=pl.BlockSpec((1, 1, H), lambda b, l: (b, 0, 0)),
        scratch_shapes=[pltpu.VMEM((S, H), jnp.float32),   # carried hidden state (f32)
                        pltpu.VMEM((S, H), jnp.bfloat16)], # bf16 copy for MXU operands
    )

    out = pl.pallas_call(
        _encoder_kernel,
        out_shape=jax.ShapeDtypeStruct((B, 1, H), jnp.float32),
        grid_spec=grid_spec,
        compiler_params=pltpu.CompilerParams(
            dimension_semantics=("parallel", "arbitrary"),
            # budget: 2 x per-layer weight slab + activations + score tile,
            # kept well under v7x's 64 MiB physical VMEM (tiny at these shapes).
            vmem_limit_bytes=48 * 1024 * 1024),
    )(emb, mask, sel,
      params["emb_ln_g"], params["emb_ln_b"],
      wqkv, bqkv, wo, bo, wi, bi, wf, bf,
      ln1_g, ln1_b, ln2_g, ln2_b)
    return out.reshape(B, H)


# ---------------------------------- main --------------------------------------
if __name__ == "__main__":
    root = jax.random.PRNGKey(0)
    k_params, k_ids = jax.random.split(root)
    params = init_params(k_params)

    input_ids = jax.random.randint(k_ids, (B, S), 0, VOCAB, dtype=jnp.int32)
    attention_mask = jnp.array(
        [[1, 1, 1, 1, 1, 1, 1, 1],
         [1, 1, 1, 1, 1, 1, 0, 0]], dtype=jnp.float32)
    token_type_ids = jnp.array(
        [[0, 0, 0, 0, 1, 1, 1, 1],
         [0, 0, 0, 0, 0, 1, 1, 1]], dtype=jnp.int32)

    # indices_list (variable-length per example) encoded as a {0,1} selection mask.
    indices_list = [[0, 1, 2], [1, 3, 5]]
    sel_mask = jnp.zeros((B, S), jnp.float32)
    for bi, inds in enumerate(indices_list):
        sel_mask = sel_mask.at[bi, jnp.array(inds)].set(1.0)

    out = context_encoder_forward(params, input_ids, attention_mask,
                                  token_type_ids, sel_mask)
    jax.block_until_ready(out)
    assert out.shape == (B, H)
    print("KERNEL_OK")
</pallas_src>

<mosaic_0001>
module attributes {stable_mosaic.version = 11 : i64} {
  func.func @_encoder_kernel(%arg0: i32, %arg1: i32, %arg2: memref<1x8x32xf32, #tpu.memory_space<vmem>>, %arg3: memref<1x1x8xf32, #tpu.memory_space<vmem>>, %arg4: memref<1x8x1xf32, #tpu.memory_space<vmem>>, %arg5: memref<1x32xf32, #tpu.memory_space<vmem>>, %arg6: memref<1x32xf32, #tpu.memory_space<vmem>>, %arg7: memref<1x32x96xbf16, #tpu.memory_space<vmem>>, %arg8: memref<1x1x96xf32, #tpu.memory_space<vmem>>, %arg9: memref<1x32x32xbf16, #tpu.memory_space<vmem>>, %arg10: memref<1x1x32xf32, #tpu.memory_space<vmem>>, %arg11: memref<1x32x64xbf16, #tpu.memory_space<vmem>>, %arg12: memref<1x1x64xf32, #tpu.memory_space<vmem>>, %arg13: memref<1x64x32xbf16, #tpu.memory_space<vmem>>, %arg14: memref<1x1x32xf32, #tpu.memory_space<vmem>>, %arg15: memref<1x1x32xf32, #tpu.memory_space<vmem>>, %arg16: memref<1x1x32xf32, #tpu.memory_space<vmem>>, %arg17: memref<1x1x32xf32, #tpu.memory_space<vmem>>, %arg18: memref<1x1x32xf32, #tpu.memory_space<vmem>>, %arg19: memref<1x1x32xf32, #tpu.memory_space<vmem>>, %arg20: memref<8x32xf32, #tpu.memory_space<vmem>>, %arg21: memref<8x32xbf16, #tpu.memory_space<vmem>>) attributes {dimension_semantics = [#tpu.dimension_semantics<parallel>, #tpu.dimension_semantics<arbitrary>], iteration_bounds = array<i64: 2, 2>, scalar_prefetch = 0 : i64, scratch_operands = 2 : i64, tpu.core_type = #tpu.core_type<tc>, window_params = [{transform_indices = @transform_0, window_bounds = array<i64: 1, 8, 32>}, {transform_indices = @transform_1, window_bounds = array<i64: 1, 1, 8>}, {transform_indices = @transform_2, window_bounds = array<i64: 1, 8, 1>}, {pipeline_mode = #tpu.pipeline_mode<synchronous>, transform_indices = @transform_3, window_bounds = array<i64: 1, 32>}, {pipeline_mode = #tpu.pipeline_mode<synchronous>, transform_indices = @transform_4, window_bounds = array<i64: 1, 32>}, {transform_indices = @transform_5, window_bounds = array<i64: 1, 32, 96>}, {transform_indices = @transform_6, window_bounds = array<i64: 1, 1, 96>}, {transform_indices = @transform_7, window_bounds = array<i64: 1, 32, 32>}, {transform_indices = @transform_8, window_bounds = array<i64: 1, 1, 32>}, {transform_indices = @transform_9, window_bounds = array<i64: 1, 32, 64>}, {transform_indices = @transform_10, window_bounds = array<i64: 1, 1, 64>}, {transform_indices = @transform_11, window_bounds = array<i64: 1, 64, 32>}, {transform_indices = @transform_12, window_bounds = array<i64: 1, 1, 32>}, {transform_indices = @transform_13, window_bounds = array<i64: 1, 1, 32>}, {transform_indices = @transform_14, window_bounds = array<i64: 1, 1, 32>}, {transform_indices = @transform_15, window_bounds = array<i64: 1, 1, 32>}, {transform_indices = @transform_16, window_bounds = array<i64: 1, 1, 32>}, {transform_indices = @transform_17, window_bounds = array<i64: 1, 1, 32>}]} {
    %c0_i32 = arith.constant 0 : i32
    %0 = arith.cmpi eq, %arg1, %c0_i32 : i32
    %1 = arith.extui %0 : i1 to i32
    %c0_i32_0 = arith.constant 0 : i32
    %2 = arith.cmpi ne, %1, %c0_i32_0 : i32
    scf.if %2 {
      %c0_80 = arith.constant 0 : index
      %c0_81 = arith.constant 0 : index
      %c0_82 = arith.constant 0 : index
      %164 = vector.load %arg2[%c0_80, %c0_81, %c0_82] : memref<1x8x32xf32, #tpu.memory_space<vmem>>, vector<1x8x32xf32>
      %165 = vector.shape_cast %164 : vector<1x8x32xf32> to vector<8x32xf32>
      %c0_83 = arith.constant 0 : index
      %c0_84 = arith.constant 0 : index
      %166 = vector.load %arg5[%c0_83, %c0_84] : memref<1x32xf32, #tpu.memory_space<vmem>>, vector<1x32xf32>
      %c0_85 = arith.constant 0 : index
      %c0_86 = arith.constant 0 : index
      %167 = vector.load %arg6[%c0_85, %c0_86] : memref<1x32xf32, #tpu.memory_space<vmem>>, vector<1x32xf32>
      %cst_87 = arith.constant dense<0.000000e+00> : vector<8xf32>
      %168 = vector.multi_reduction <add>, %165, %cst_87 [1] : vector<8x32xf32> to vector<8xf32>
      %169 = vector.shape_cast %168 : vector<8xf32> to vector<8x1xf32>
      %cst_88 = arith.constant 3.200000e+01 : f32
      %170 = vector.broadcast %cst_88 : f32 to vector<8x1xf32>
      %171 = arith.divf %169, %170 : vector<8x1xf32>
      %172 = vector.broadcast %171 : vector<8x1xf32> to vector<8x32xf32>
      %173 = arith.subf %165, %172 : vector<8x32xf32>
      %174 = arith.mulf %173, %173 : vector<8x32xf32>
      %cst_89 = arith.constant dense<0.000000e+00> : vector<8xf32>
      %175 = vector.multi_reduction <add>, %174, %cst_89 [1] : vector<8x32xf32> to vector<8xf32>
      %176 = vector.shape_cast %175 : vector<8xf32> to vector<8x1xf32>
      %cst_90 = arith.constant 3.200000e+01 : f32
      %177 = vector.broadcast %cst_90 : f32 to vector<8x1xf32>
      %178 = arith.divf %176, %177 : vector<8x1xf32>
      %179 = vector.broadcast %171 : vector<8x1xf32> to vector<8x32xf32>
      %180 = arith.subf %165, %179 : vector<8x32xf32>
      %cst_91 = arith.constant 9.99999996E-13 : f32
      %181 = vector.broadcast %cst_91 : f32 to vector<8x1xf32>
      %182 = arith.addf %178, %181 : vector<8x1xf32>
      %183 = math.rsqrt %182 : vector<8x1xf32>
      %184 = vector.broadcast %183 : vector<8x1xf32> to vector<8x32xf32>
      %185 = arith.mulf %180, %184 : vector<8x32xf32>
      %186 = vector.broadcast %166 : vector<1x32xf32> to vector<8x32xf32>
      %187 = arith.mulf %185, %186 : vector<8x32xf32>
      %188 = vector.broadcast %167 : vector<1x32xf32> to vector<8x32xf32>
      %189 = arith.addf %187, %188 : vector<8x32xf32>
      %c0_92 = arith.constant 0 : index
      %c0_93 = arith.constant 0 : index
      %190 = vector.load %arg20[%c0_92, %c0_93] : memref<8x32xf32, #tpu.memory_space<vmem>>, vector<8x32xf32>
      tpu.vector_store %arg20[%c0_92, %c0_93], %189 {strides = array<i32>} : memref<8x32xf32, #tpu.memory_space<vmem>>, vector<8x32xf32>,
      %191 = arith.truncf %189 : vector<8x32xf32> to vector<8x32xbf16>
      %c0_94 = arith.constant 0 : index
      %c0_95 = arith.constant 0 : index
      %192 = vector.load %arg21[%c0_94, %c0_95] : memref<8x32xbf16, #tpu.memory_space<vmem>>, vector<8x32xbf16>
      tpu.vector_store %arg21[%c0_94, %c0_95], %191 {strides = array<i32>} : memref<8x32xbf16, #tpu.memory_space<vmem>>, vector<8x32xbf16>,
    } else {
    }
    %c0 = arith.constant 0 : index
    %c0_1 = arith.constant 0 : index
    %c0_2 = arith.constant 0 : index
    %3 = vector.load %arg3[%c0, %c0_1, %c0_2] : memref<1x1x8xf32, #tpu.memory_space<vmem>>, vector<1x1x8xf32>
    %4 = vector.shape_cast %3 : vector<1x1x8xf32> to vector<1x8xf32>
    %cst = arith.constant 5.000000e-01 : f32
    %5 = vector.broadcast %cst : f32 to vector<1x8xf32>
    %6 = arith.cmpf ogt, %4, %5 : vector<1x8xf32>
    %cst_3 = arith.constant 0.000000e+00 : f32
    %cst_4 = arith.constant -1.000000e+09 : f32
    %7 = vector.broadcast %cst_3 : f32 to vector<1x8xf32>
    %8 = vector.broadcast %cst_4 : f32 to vector<1x8xf32>
    %9 = arith.select %6, %7, %8 : vector<1x8xi1>, vector<1x8xf32>
    %c0_5 = arith.constant 0 : index
    %c0_6 = arith.constant 0 : index
    %10 = vector.load %arg20[%c0_5, %c0_6] : memref<8x32xf32, #tpu.memory_space<vmem>>, vector<8x32xf32>
    %c0_7 = arith.constant 0 : index
    %c0_8 = arith.constant 0 : index
    %11 = vector.load %arg21[%c0_7, %c0_8] : memref<8x32xbf16, #tpu.memory_space<vmem>>, vector<8x32xbf16>
    %c0_9 = arith.constant 0 : index
    %c0_10 = arith.constant 0 : index
    %c0_11 = arith.constant 0 : index
    %12 = vector.load %arg7[%c0_9, %c0_10, %c0_11] : memref<1x32x96xbf16, #tpu.memory_space<vmem>>, vector<1x32x96xbf16>
    %13 = vector.shape_cast %12 : vector<1x32x96xbf16> to vector<32x96xbf16>
    %c0_12 = arith.constant 0 : index
    %c0_13 = arith.constant 0 : index
    %c0_14 = arith.constant 0 : index
    %14 = vector.load %arg9[%c0_12, %c0_13, %c0_14] : memref<1x32x32xbf16, #tpu.memory_space<vmem>>, vector<1x32x32xbf16>
    %15 = vector.shape_cast %14 : vector<1x32x32xbf16> to vector<32x32xbf16>
    %c0_15 = arith.constant 0 : index
    %c0_16 = arith.constant 0 : index
    %c0_17 = arith.constant 0 : index
    %16 = vector.load %arg11[%c0_15, %c0_16, %c0_17] : memref<1x32x64xbf16, #tpu.memory_space<vmem>>, vector<1x32x64xbf16>
    %17 = vector.shape_cast %16 : vector<1x32x64xbf16> to vector<32x64xbf16>
    %c0_18 = arith.constant 0 : index
    %c0_19 = arith.constant 0 : index
    %c0_20 = arith.constant 0 : index
    %18 = vector.load %arg13[%c0_18, %c0_19, %c0_20] : memref<1x64x32xbf16, #tpu.memory_space<vmem>>, vector<1x64x32xbf16>
    %19 = vector.shape_cast %18 : vector<1x64x32xbf16> to vector<64x32xbf16>
    %cst_21 = arith.constant dense<0.000000e+00> : vector<8x96xf32>
    %20 = tpu.matmul %11, %13, %cst_21 {dimension_numbers = #tpu.dot_dimension_numbers<[1], [0], [0], [1], [0, 0, 1, 1], [], []>} : vector<8x32xbf16>, vector<32x96xbf16>, vector<8x96xf32> -> vector<8x96xf32>
    %c0_22 = arith.constant 0 : index
    %c0_23 = arith.constant 0 : index
    %c0_24 = arith.constant 0 : index
    %21 = vector.load %arg8[%c0_22, %c0_23, %c0_24] : memref<1x1x96xf32, #tpu.memory_space<vmem>>, vector<1x1x96xf32>
    %22 = vector.shape_cast %21 : vector<1x1x96xf32> to vector<1x96xf32>
    %23 = vector.broadcast %22 : vector<1x96xf32> to vector<8x96xf32>
    %24 = arith.addf %20, %23 : vector<8x96xf32>
    %25 = arith.truncf %24 : vector<8x96xf32> to vector<8x96xbf16>
    %cst_25 = arith.constant 0.000000e+00 : f32
    %26 = vector.broadcast %cst_25 : f32 to vector<8x32xf32>
    %27 = vector.extract_strided_slice %25 {offsets = [0, 0], sizes = [8, 16], strides = [1, 1]} : vector<8x96xbf16> to vector<8x16xbf16>
    %28 = vector.extract_strided_slice %25 {offsets = [0, 16], sizes = [8, 16], strides = [1, 1]} : vector<8x96xbf16> to vector<8x16xbf16>
    %29 = vector.extract_strided_slice %25 {offsets = [0, 32], sizes = [8, 16], strides = [1, 1]} : vector<8x96xbf16> to vector<8x16xbf16>
    %cst_26 = arith.constant dense<0.000000e+00> : vector<8x8xf32>
    %30 = tpu.matmul %27, %28, %cst_26 {dimension_numbers = #tpu.dot_dimension_numbers<[1], [1], [0], [0], [0, 0, 1, 0], [], []>} : vector<8x16xbf16>, vector<8x16xbf16>, vector<8x8xf32> -> vector<8x8xf32>
    %cst_27 = arith.constant 2.500000e-01 : f32
    %31 = vector.broadcast %cst_27 : f32 to vector<8x8xf32>
    %32 = arith.mulf %30, %31 : vector<8x8xf32>
    %33 = vector.broadcast %9 : vector<1x8xf32> to vector<8x8xf32>
    %34 = arith.addf %32, %33 : vector<8x8xf32>
    %cst_28 = arith.constant dense<0xFF800000> : vector<8xf32>
    %35 = vector.multi_reduction <maximumf>, %34, %cst_28 [1] : vector<8x8xf32> to vector<8xf32>
    %36 = vector.shape_cast %35 : vector<8xf32> to vector<8x1xf32>
    %37 = vector.broadcast %36 : vector<8x1xf32> to vector<8x8xf32>
    %38 = arith.subf %34, %37 : vector<8x8xf32>
    %39 = math.exp %38 : vector<8x8xf32>
    %cst_29 = arith.constant dense<0.000000e+00> : vector<8xf32>
    %40 = vector.multi_reduction <add>, %39, %cst_29 [1] : vector<8x8xf32> to vector<8xf32>
    %41 = vector.shape_cast %40 : vector<8xf32> to vector<8x1xf32>
    %42 = tpu.reciprocal %41 {approx = true} : vector<8x1xf32> -> vector<8x1xf32>
    %43 = vector.broadcast %42 : vector<8x1xf32> to vector<8x8xf32>
    %44 = arith.mulf %39, %43 : vector<8x8xf32>
    %45 = arith.truncf %44 : vector<8x8xf32> to vector<8x8xbf16>
    %cst_30 = arith.constant dense<0.000000e+00> : vector<8x16xf32>
    %46 = tpu.matmul %45, %29, %cst_30 {dimension_numbers = #tpu.dot_dimension_numbers<[1], [0], [0], [1], [0, 0, 1, 1], [], []>} : vector<8x8xbf16>, vector<8x16xbf16>, vector<8x16xf32> -> vector<8x16xf32>
    %47 = arith.truncf %46 : vector<8x16xf32> to vector<8x16xbf16>
    %48 = vector.extract_strided_slice %15 {offsets = [0, 0], sizes = [16, 32], strides = [1, 1]} : vector<32x32xbf16> to vector<16x32xbf16>
    %cst_31 = arith.constant dense<0.000000e+00> : vector<8x32xf32>
    %49 = tpu.matmul %47, %48, %cst_31 {dimension_numbers = #tpu.dot_dimension_numbers<[1], [0], [0], [1], [0, 0, 1, 1], [], []>} : vector<8x16xbf16>, vector<16x32xbf16>, vector<8x32xf32> -> vector<8x32xf32>
    %50 = arith.addf %26, %49 : vector<8x32xf32>
    %51 = vector.extract_strided_slice %25 {offsets = [0, 48], sizes = [8, 16], strides = [1, 1]} : vector<8x96xbf16> to vector<8x16xbf16>
    %52 = vector.extract_strided_slice %25 {offsets = [0, 64], sizes = [8, 16], strides = [1, 1]} : vector<8x96xbf16> to vector<8x16xbf16>
    %53 = vector.extract_strided_slice %25 {offsets = [0, 80], sizes = [8, 16], strides = [1, 1]} : vector<8x96xbf16> to vector<8x16xbf16>
    %cst_32 = arith.constant dense<0.000000e+00> : vector<8x8xf32>
    %54 = tpu.matmul %51, %52, %cst_32 {dimension_numbers = #tpu.dot_dimension_numbers<[1], [1], [0], [0], [0, 0, 1, 0], [], []>} : vector<8x16xbf16>, vector<8x16xbf16>, vector<8x8xf32> -> vector<8x8xf32>
    %cst_33 = arith.constant 2.500000e-01 : f32
    %55 = vector.broadcast %cst_33 : f32 to vector<8x8xf32>
    %56 = arith.mulf %54, %55 : vector<8x8xf32>
    %57 = vector.broadcast %9 : vector<1x8xf32> to vector<8x8xf32>
    %58 = arith.addf %56, %57 : vector<8x8xf32>
    %cst_34 = arith.constant dense<0xFF800000> : vector<8xf32>
    %59 = vector.multi_reduction <maximumf>, %58, %cst_34 [1] : vector<8x8xf32> to vector<8xf32>
    %60 = vector.shape_cast %59 : vector<8xf32> to vector<8x1xf32>
    %61 = vector.broadcast %60 : vector<8x1xf32> to vector<8x8xf32>
    %62 = arith.subf %58, %61 : vector<8x8xf32>
    %63 = math.exp %62 : vector<8x8xf32>
    %cst_35 = arith.constant dense<0.000000e+00> : vector<8xf32>
    %64 = vector.multi_reduction <add>, %63, %cst_35 [1] : vector<8x8xf32> to vector<8xf32>
    %65 = vector.shape_cast %64 : vector<8xf32> to vector<8x1xf32>
    %66 = tpu.reciprocal %65 {approx = true} : vector<8x1xf32> -> vector<8x1xf32>
    %67 = vector.broadcast %66 : vector<8x1xf32> to vector<8x8xf32>
    %68 = arith.mulf %63, %67 : vector<8x8xf32>
    %69 = arith.truncf %68 : vector<8x8xf32> to vector<8x8xbf16>
    %cst_36 = arith.constant dense<0.000000e+00> : vector<8x16xf32>
    %70 = tpu.matmul %69, %53, %cst_36 {dimension_numbers = #tpu.dot_dimension_numbers<[1], [0], [0], [1], [0, 0, 1, 1], [], []>} : vector<8x8xbf16>, vector<8x16xbf16>, vector<8x16xf32> -> vector<8x16xf32>
    %71 = arith.truncf %70 : vector<8x16xf32> to vector<8x16xbf16>
    %72 = vector.extract_strided_slice %15 {offsets = [16, 0], sizes = [16, 32], strides = [1, 1]} : vector<32x32xbf16> to vector<16x32xbf16>
    %cst_37 = arith.constant dense<0.000000e+00> : vector<8x32xf32>
    %73 = tpu.matmul %71, %72, %cst_37 {dimension_numbers = #tpu.dot_dimension_numbers<[1], [0], [0], [1], [0, 0, 1, 1], [], []>} : vector<8x16xbf16>, vector<16x32xbf16>, vector<8x32xf32> -> vector<8x32xf32>
    %74 = arith.addf %50, %73 : vector<8x32xf32>
    %c0_38 = arith.constant 0 : index
    %c0_39 = arith.constant 0 : index
    %c0_40 = arith.constant 0 : index
    %75 = vector.load %arg10[%c0_38, %c0_39, %c0_40] : memref<1x1x32xf32, #tpu.memory_space<vmem>>, vector<1x1x32xf32>
    %76 = vector.shape_cast %75 : vector<1x1x32xf32> to vector<1x32xf32>
    %77 = vector.broadcast %76 : vector<1x32xf32> to vector<8x32xf32>
    %78 = arith.addf %74, %77 : vector<8x32xf32>
    %79 = arith.addf %78, %10 : vector<8x32xf32>
    %c0_41 = arith.constant 0 : index
    %c0_42 = arith.constant 0 : index
    %c0_43 = arith.constant 0 : index
    %80 = vector.load %arg15[%c0_41, %c0_42, %c0_43] : memref<1x1x32xf32, #tpu.memory_space<vmem>>, vector<1x1x32xf32>
    %81 = vector.shape_cast %80 : vector<1x1x32xf32> to vector<1x32xf32>
    %c0_44 = arith.constant 0 : index
    %c0_45 = arith.constant 0 : index
    %c0_46 = arith.constant 0 : index
    %82 = vector.load %arg16[%c0_44, %c0_45, %c0_46] : memref<1x1x32xf32, #tpu.memory_space<vmem>>, vector<1x1x32xf32>
    %83 = vector.shape_cast %82 : vector<1x1x32xf32> to vector<1x32xf32>
    %cst_47 = arith.constant dense<0.000000e+00> : vector<8xf32>
    %84 = vector.multi_reduction <add>, %79, %cst_47 [1] : vector<8x32xf32> to vector<8xf32>
    %85 = vector.shape_cast %84 : vector<8xf32> to vector<8x1xf32>
    %cst_48 = arith.constant 3.200000e+01 : f32
    %86 = vector.broadcast %cst_48 : f32 to vector<8x1xf32>
    %87 = arith.divf %85, %86 : vector<8x1xf32>
    %88 = vector.broadcast %87 : vector<8x1xf32> to vector<8x32xf32>
    %89 = arith.subf %79, %88 : vector<8x32xf32>
    %90 = arith.mulf %89, %89 : vector<8x32xf32>
    %cst_49 = arith.constant dense<0.000000e+00> : vector<8xf32>
    %91 = vector.multi_reduction <add>, %90, %cst_49 [1] : vector<8x32xf32> to vector<8xf32>
    %92 = vector.shape_cast %91 : vector<8xf32> to vector<8x1xf32>
    %cst_50 = arith.constant 3.200000e+01 : f32
    %93 = vector.broadcast %cst_50 : f32 to vector<8x1xf32>
    %94 = arith.divf %92, %93 : vector<8x1xf32>
    %95 = vector.broadcast %87 : vector<8x1xf32> to vector<8x32xf32>
    %96 = arith.subf %79, %95 : vector<8x32xf32>
    %cst_51 = arith.constant 9.99999996E-13 : f32
    %97 = vector.broadcast %cst_51 : f32 to vector<8x1xf32>
    %98 = arith.addf %94, %97 : vector<8x1xf32>
    %99 = math.rsqrt %98 : vector<8x1xf32>
    %100 = vector.broadcast %99 : vector<8x1xf32> to vector<8x32xf32>
    %101 = arith.mulf %96, %100 : vector<8x32xf32>
    %102 = vector.broadcast %81 : vector<1x32xf32> to vector<8x32xf32>
    %103 = arith.mulf %101, %102 : vector<8x32xf32>
    %104 = vector.broadcast %83 : vector<1x32xf32> to vector<8x32xf32>
    %105 = arith.addf %103, %104 : vector<8x32xf32>
    %106 = arith.truncf %105 : vector<8x32xf32> to vector<8x32xbf16>
    %cst_52 = arith.constant dense<0.000000e+00> : vector<8x64xf32>
    %107 = tpu.matmul %106, %17, %cst_52 {dimension_numbers = #tpu.dot_dimension_numbers<[1], [0], [0], [1], [0, 0, 1, 1], [], []>} : vector<8x32xbf16>, vector<32x64xbf16>, vector<8x64xf32> -> vector<8x64xf32>
    %c0_53 = arith.constant 0 : index
    %c0_54 = arith.constant 0 : index
    %c0_55 = arith.constant 0 : index
    %108 = vector.load %arg12[%c0_53, %c0_54, %c0_55] : memref<1x1x64xf32, #tpu.memory_space<vmem>>, vector<1x1x64xf32>
    %109 = vector.shape_cast %108 : vector<1x1x64xf32> to vector<1x64xf32>
    %110 = vector.broadcast %109 : vector<1x64xf32> to vector<8x64xf32>
    %111 = arith.addf %107, %110 : vector<8x64xf32>
    %112 = arith.mulf %111, %111 : vector<8x64xf32>
    %113 = arith.mulf %111, %112 : vector<8x64xf32>
    %cst_56 = arith.constant 4.471500e-02 : f32
    %114 = vector.broadcast %cst_56 : f32 to vector<8x64xf32>
    %115 = arith.mulf %114, %113 : vector<8x64xf32>
    %116 = arith.addf %111, %115 : vector<8x64xf32>
    %cst_57 = arith.constant 0.797884583 : f32
    %117 = vector.broadcast %cst_57 : f32 to vector<8x64xf32>
    %118 = arith.mulf %117, %116 : vector<8x64xf32>
    %119 = math.tanh %118 : vector<8x64xf32>
    %cst_58 = arith.constant 1.000000e+00 : f32
    %120 = vector.broadcast %cst_58 : f32 to vector<8x64xf32>
    %121 = arith.addf %120, %119 : vector<8x64xf32>
    %cst_59 = arith.constant 5.000000e-01 : f32
    %122 = vector.broadcast %cst_59 : f32 to vector<8x64xf32>
    %123 = arith.mulf %122, %121 : vector<8x64xf32>
    %124 = arith.mulf %111, %123 : vector<8x64xf32>
    %125 = arith.truncf %124 : vector<8x64xf32> to vector<8x64xbf16>
    %cst_60 = arith.constant dense<0.000000e+00> : vector<8x32xf32>
    %126 = tpu.matmul %125, %19, %cst_60 {dimension_numbers = #tpu.dot_dimension_numbers<[1], [0], [0], [1], [0, 0, 1, 1], [], []>} : vector<8x64xbf16>, vector<64x32xbf16>, vector<8x32xf32> -> vector<8x32xf32>
    %c0_61 = arith.constant 0 : index
    %c0_62 = arith.constant 0 : index
    %c0_63 = arith.constant 0 : index
    %127 = vector.load %arg14[%c0_61, %c0_62, %c0_63] : memref<1x1x32xf32, #tpu.memory_space<vmem>>, vector<1x1x32xf32>
    %128 = vector.shape_cast %127 : vector<1x1x32xf32> to vector<1x32xf32>
    %129 = vector.broadcast %128 : vector<1x32xf32> to vector<8x32xf32>
    %130 = arith.addf %126, %129 : vector<8x32xf32>
    %131 = arith.addf %130, %105 : vector<8x32xf32>
    %c0_64 = arith.constant 0 : index
    %c0_65 = arith.constant 0 : index
    %c0_66 = arith.constant 0 : index
    %132 = vector.load %arg17[%c0_64, %c0_65, %c0_66] : memref<1x1x32xf32, #tpu.memory_space<vmem>>, vector<1x1x32xf32>
    %133 = vector.shape_cast %132 : vector<1x1x32xf32> to vector<1x32xf32>
    %c0_67 = arith.constant 0 : index
    %c0_68 = arith.constant 0 : index
    %c0_69 = arith.constant 0 : index
    %134 = vector.load %arg18[%c0_67, %c0_68, %c0_69] : memref<1x1x32xf32, #tpu.memory_space<vmem>>, vector<1x1x32xf32>
    %135 = vector.shape_cast %134 : vector<1x1x32xf32> to vector<1x32xf32>
    %cst_70 = arith.constant dense<0.000000e+00> : vector<8xf32>
    %136 = vector.multi_reduction <add>, %131, %cst_70 [1] : vector<8x32xf32> to vector<8xf32>
    %137 = vector.shape_cast %136 : vector<8xf32> to vector<8x1xf32>
    %cst_71 = arith.constant 3.200000e+01 : f32
    %138 = vector.broadcast %cst_71 : f32 to vector<8x1xf32>
    %139 = arith.divf %137, %138 : vector<8x1xf32>
    %140 = vector.broadcast %139 : vector<8x1xf32> to vector<8x32xf32>
    %141 = arith.subf %131, %140 : vector<8x32xf32>
    %142 = arith.mulf %141, %141 : vector<8x32xf32>
    %cst_72 = arith.constant dense<0.000000e+00> : vector<8xf32>
    %143 = vector.multi_reduction <add>, %142, %cst_72 [1] : vector<8x32xf32> to vector<8xf32>
    %144 = vector.shape_cast %143 : vector<8xf32> to vector<8x1xf32>
    %cst_73 = arith.constant 3.200000e+01 : f32
    %145 = vector.broadcast %cst_73 : f32 to vector<8x1xf32>
    %146 = arith.divf %144, %145 : vector<8x1xf32>
    %147 = vector.broadcast %139 : vector<8x1xf32> to vector<8x32xf32>
    %148 = arith.subf %131, %147 : vector<8x32xf32>
    %cst_74 = arith.constant 9.99999996E-13 : f32
    %149 = vector.broadcast %cst_74 : f32 to vector<8x1xf32>
    %150 = arith.addf %146, %149 : vector<8x1xf32>
    %151 = math.rsqrt %150 : vector<8x1xf32>
    %152 = vector.broadcast %151 : vector<8x1xf32> to vector<8x32xf32>
    %153 = arith.mulf %148, %152 : vector<8x32xf32>
    %154 = vector.broadcast %133 : vector<1x32xf32> to vector<8x32xf32>
    %155 = arith.mulf %153, %154 : vector<8x32xf32>
    %156 = vector.broadcast %135 : vector<1x32xf32> to vector<8x32xf32>
    %157 = arith.addf %155, %156 : vector<8x32xf32>
    %c0_75 = arith.constant 0 : index
    %c0_76 = arith.constant 0 : index
    %158 = vector.load %arg20[%c0_75, %c0_76] : memref<8x32xf32, #tpu.memory_space<vmem>>, vector<8x32xf32>
    tpu.vector_store %arg20[%c0_75, %c0_76], %157 {strides = array<i32>} : memref<8x32xf32, #tpu.memory_space<vmem>>, vector<8x32xf32>,
    %159 = arith.truncf %157 : vector<8x32xf32> to vector<8x32xbf16>
    %c0_77 = arith.constant 0 : index
    %c0_78 = arith.constant 0 : index
    %160 = vector.load %arg21[%c0_77, %c0_78] : memref<8x32xbf16, #tpu.memory_space<vmem>>, vector<8x32xbf16>
    tpu.vector_store %arg21[%c0_77, %c0_78], %159 {strides = array<i32>} : memref<8x32xbf16, #tpu.memory_space<vmem>>, vector<8x32xbf16>,
    %c1_i32 = arith.constant 1 : i32
    %161 = arith.cmpi eq, %arg1, %c1_i32 : i32
    %162 = arith.extui %161 : i1 to i32
    %c0_i32_79 = arith.constant 0 : i32
    %163 = arith.cmpi ne, %162, %c0_i32_79 : i32
    scf.if %163 {
      %c0_80 = arith.constant 0 : index
      %c0_81 = arith.constant 0 : index
      %c0_82 = arith.constant 0 : index
      %164 = vector.load %arg4[%c0_80, %c0_81, %c0_82] : memref<1x8x1xf32, #tpu.memory_space<vmem>>, vector<1x8x1xf32>
      %165 = vector.shape_cast %164 : vector<1x8x1xf32> to vector<8x1xf32>
      %166 = vector.broadcast %165 : vector<8x1xf32> to vector<8x32xf32>
      %167 = arith.mulf %157, %166 : vector<8x32xf32>
      %cst_83 = arith.constant dense<0.000000e+00> : vector<32xf32>
      %168 = vector.multi_reduction <add>, %167, %cst_83 [0] : vector<8x32xf32> to vector<32xf32>
      %169 = vector.shape_cast %168 : vector<32xf32> to vector<1x32xf32>
      %cst_84 = arith.constant dense<0.000000e+00> : vector<1xf32>
      %170 = vector.multi_reduction <add>, %165, %cst_84 [0] : vector<8x1xf32> to vector<1xf32>
      %171 = vector.shape_cast %170 : vector<1xf32> to vector<1x1xf32>
      %cst_85 = arith.constant 1.000000e+00 : f32
      %172 = vector.broadcast %cst_85 : f32 to vector<1x1xf32>
      %173 = arith.maximumf %171, %172 : vector<1x1xf32>
      %174 = tpu.reciprocal %173 {approx = true} : vector<1x1xf32> -> vector<1x1xf32>
      %175 = vector.broadcast %174 : vector<1x1xf32> to vector<1x32xf32>
      %176 = arith.mulf %169, %175 : vector<1x32xf32>
      %177 = arith.mulf %176, %176 : vector<1x32xf32>
      %cst_86 = arith.constant dense<0.000000e+00> : vector<1xf32>
      %178 = vector.multi_reduction <add>, %177, %cst_86 [1] : vector<1x32xf32> to vector<1xf32>
      %179 = vector.shape_cast %178 : vector<1xf32> to vector<1x1xf32>
      %cst_87 = arith.constant 1.000000e-24 : f32
      %180 = vector.broadcast %cst_87 : f32 to vector<1x1xf32>
      %181 = arith.maximumf %179, %180 : vector<1x1xf32>
      %182 = math.rsqrt %181 : vector<1x1xf32>
      %183 = vector.broadcast %182 : vector<1x1xf32> to vector<1x32xf32>
      %184 = arith.mulf %176, %183 : vector<1x32xf32>
      %c0_88 = arith.constant 0 : index
      %c0_89 = arith.constant 0 : index
      %c0_90 = arith.constant 0 : index
      %185 = vector.load %arg19[%c0_88, %c0_89, %c0_90] : memref<1x1x32xf32, #tpu.memory_space<vmem>>, vector<1x1x32xf32>
      %186 = vector.shape_cast %185 : vector<1x1x32xf32> to vector<1x32xf32>
      %187 = vector.shape_cast %184 : vector<1x32xf32> to vector<1x1x32xf32>
      tpu.vector_store %arg19[%c0_88, %c0_89, %c0_90], %187 {strides = array<i32>} : memref<1x1x32xf32, #tpu.memory_space<vmem>>, vector<1x1x32xf32>,
    } else {
    }
    return
  }
  func.func @transform_0(%arg0: i32, %arg1: i32) -> (i32, i32, i32) {
    %c0_i32 = arith.constant 0 : i32
    %c0_i32_0 = arith.constant 0 : i32
    %c0_i32_1 = arith.constant 0 : i32
    return %arg0, %c0_i32, %c0_i32_0 : i32, i32, i32
  }
  func.func @transform_1(%arg0: i32, %arg1: i32) -> (i32, i32, i32) {
    %c0_i32 = arith.constant 0 : i32
    %c0_i32_0 = arith.constant 0 : i32
    %c0_i32_1 = arith.constant 0 : i32
    return %arg0, %c0_i32, %c0_i32_0 : i32, i32, i32
  }
  func.func @transform_2(%arg0: i32, %arg1: i32) -> (i32, i32, i32) {
    %c0_i32 = arith.constant 0 : i32
    %c0_i32_0 = arith.constant 0 : i32
    %c0_i32_1 = arith.constant 0 : i32
    return %arg0, %c0_i32, %c0_i32_0 : i32, i32, i32
  }
  func.func @transform_3(%arg0: i32, %arg1: i32) -> (i32, i32) {
    %c0_i32 = arith.constant 0 : i32
    %c0_i32_0 = arith.constant 0 : i32
    %c0_i32_1 = arith.constant 0 : i32
    return %c0_i32, %c0_i32_0 : i32, i32
  }
  func.func @transform_4(%arg0: i32, %arg1: i32) -> (i32, i32) {
    %c0_i32 = arith.constant 0 : i32
    %c0_i32_0 = arith.constant 0 : i32
    %c0_i32_1 = arith.constant 0 : i32
    return %c0_i32, %c0_i32_0 : i32, i32
  }
  func.func @transform_5(%arg0: i32, %arg1: i32) -> (i32, i32, i32) {
    %c0_i32 = arith.constant 0 : i32
    %c0_i32_0 = arith.constant 0 : i32
    %c0_i32_1 = arith.constant 0 : i32
    return %arg1, %c0_i32, %c0_i32_0 : i32, i32, i32
  }
  func.func @transform_6(%arg0: i32, %arg1: i32) -> (i32, i32, i32) {
    %c0_i32 = arith.constant 0 : i32
    %c0_i32_0 = arith.constant 0 : i32
    %c0_i32_1 = arith.constant 0 : i32
    return %arg1, %c0_i32, %c0_i32_0 : i32, i32, i32
  }
  func.func @transform_7(%arg0: i32, %arg1: i32) -> (i32, i32, i32) {
    %c0_i32 = arith.constant 0 : i32
    %c0_i32_0 = arith.constant 0 : i32
    %c0_i32_1 = arith.constant 0 : i32
    return %arg1, %c0_i32, %c0_i32_0 : i32, i32, i32
  }
  func.func @transform_8(%arg0: i32, %arg1: i32) -> (i32, i32, i32) {
    %c0_i32 = arith.constant 0 : i32
    %c0_i32_0 = arith.constant 0 : i32
    %c0_i32_1 = arith.constant 0 : i32
    return %arg1, %c0_i32, %c0_i32_0 : i32, i32, i32
  }
  func.func @transform_9(%arg0: i32, %arg1: i32) -> (i32, i32, i32) {
    %c0_i32 = arith.constant 0 : i32
    %c0_i32_0 = arith.constant 0 : i32
    %c0_i32_1 = arith.constant 0 : i32
    return %arg1, %c0_i32, %c0_i32_0 : i32, i32, i32
  }
  func.func @transform_10(%arg0: i32, %arg1: i32) -> (i32, i32, i32) {
    %c0_i32 = arith.constant 0 : i32
    %c0_i32_0 = arith.constant 0 : i32
    %c0_i32_1 = arith.constant 0 : i32
    return %arg1, %c0_i32, %c0_i32_0 : i32, i32, i32
  }
  func.func @transform_11(%arg0: i32, %arg1: i32) -> (i32, i32, i32) {
    %c0_i32 = arith.constant 0 : i32
    %c0_i32_0 = arith.constant 0 : i32
    %c0_i32_1 = arith.constant 0 : i32
    return %arg1, %c0_i32, %c0_i32_0 : i32, i32, i32
  }
  func.func @transform_12(%arg0: i32, %arg1: i32) -> (i32, i32, i32) {
    %c0_i32 = arith.constant 0 : i32
    %c0_i32_0 = arith.constant 0 : i32
    %c0_i32_1 = arith.constant 0 : i32
    return %arg1, %c0_i32, %c0_i32_0 : i32, i32, i32
  }
  func.func @transform_13(%arg0: i32, %arg1: i32) -> (i32, i32, i32) {
    %c0_i32 = arith.constant 0 : i32
    %c0_i32_0 = arith.constant 0 : i32
    %c0_i32_1 = arith.constant 0 : i32
    return %arg1, %c0_i32, %c0_i32_0 : i32, i32, i32
  }
  func.func @transform_14(%arg0: i32, %arg1: i32) -> (i32, i32, i32) {
    %c0_i32 = arith.constant 0 : i32
    %c0_i32_0 = arith.constant 0 : i32
    %c0_i32_1 = arith.constant 0 : i32
    return %arg1, %c0_i32, %c0_i32_0 : i32, i32, i32
  }
  func.func @transform_15(%arg0: i32, %arg1: i32) -> (i32, i32, i32) {
    %c0_i32 = arith.constant 0 : i32
    %c0_i32_0 = arith.constant 0 : i32
    %c0_i32_1 = arith.constant 0 : i32
    return %arg1, %c0_i32, %c0_i32_0 : i32, i32, i32
  }
  func.func @transform_16(%arg0: i32, %arg1: i32) -> (i32, i32, i32) {
    %c0_i32 = arith.constant 0 : i32
    %c0_i32_0 = arith.constant 0 : i32
    %c0_i32_1 = arith.constant 0 : i32
    return %arg1, %c0_i32, %c0_i32_0 : i32, i32, i32
  }
  func.func @transform_17(%arg0: i32, %arg1: i32) -> (i32, i32, i32) {
    %c0_i32 = arith.constant 0 : i32
    %c0_i32_0 = arith.constant 0 : i32
    %c0_i32_1 = arith.constant 0 : i32
    return %arg0, %c0_i32, %c0_i32_0 : i32, i32, i32
  }
}

</mosaic_0001>

<bundles_post_ra>
// kernel: tpu_custom_call.1
= control target key start
LH: loop header
LB: loop body
LE: loop exit
PB: predicated region body
PF: predicated region fallthrough
CT: control target
= control target key end

     0   :  { %s2441_s0 = inlined_call_operand.vmem [shape: f32[2,8,32], index: 0, kind: input, shape index: {}]   ;;  %s2442_s1 = inlined_call_operand.vmem [shape: f32[2,1,8], index: 1, kind: input, shape index: {}]   ;;  %s2443_s2 = inlined_call_operand.vmem [shape: f32[2,8,1], index: 2, kind: input, shape index: {}]   ;;  %s2444_s3 = inlined_call_operand.vmem [shape: f32[1,32], index: 3, kind: input, shape index: {}]   ;;  %s2445_s4 = inlined_call_operand.hbm [shape: f32[1,32], index: 4, kind: input, shape index: {}]   ;;  %s2446_s5 = inlined_call_operand.vmem [shape: bf16[2,32,96], index: 5, kind: input, shape index: {}]   ;;  %s2447_s6 = inlined_call_operand.vmem [shape: f32[2,1,96], index: 6, kind: input, shape index: {}]   ;;  %s2448_s7 = inlined_call_operand.vmem [shape: bf16[2,32,32], index: 7, kind: input, shape index: {}]   ;;  %s2449_s8 = inlined_call_operand.vmem [shape: f32[2,1,32], index: 8, kind: input, shape index: {}]   ;;  %s2450_s9 = inlined_call_operand.vmem [shape: bf16[2,32,64], index: 9, kind: input, shape index: {}]   ;;  %s2451_s10 = inlined_call_operand.vmem [shape: f32[2,1,64], index: 10, kind: input, shape index: {}]   ;;  %s2452_s11 = inlined_call_operand.vmem [shape: bf16[2,64,32], index: 11, kind: input, shape index: {}]   ;;  %s2453_s12 = inlined_call_operand.vmem [shape: f32[2,1,32], index: 12, kind: input, shape index: {}]   ;;  %s2454_s13 = inlined_call_operand.vmem [shape: f32[2,1,32], index: 13, kind: input, shape index: {}]   ;;  %s2455_s14 = inlined_call_operand.vmem [shape: f32[2,1,32], index: 14, kind: input, shape index: {}]   ;;  %s2456_s15 = inlined_call_operand.hbm [shape: f32[2,1,32], index: 15, kind: input, shape index: {}]   ;;  %s2457_s16 = inlined_call_operand.vmem [shape: f32[2,1,32], index: 16, kind: input, shape index: {}]   ;;  %s2458_s17 = inlined_call_operand.hbm [shape: f32[2,1,32], index: 17, kind: output, shape index: {}]  }
   0x1   :  { %2474 = sst [smem:[#allocation29_spill]] %s2441_s0 }
   0x2   :  { %2475 = sst [smem:[#allocation30_spill]] %s2442_s1 }
   0x3   :  { %2476 = sst [smem:[#allocation31_spill]] %s2443_s2 }
   0x4   :  { %2477 = sst [smem:[#allocation32_spill]] %s2444_s3 }
   0x5   :  { %2478 = sst [smem:[#allocation33_spill]] %s2445_s4 }
   0x6   :  { %2479 = sst [smem:[#allocation34_spill]] %s2446_s5 }
   0x7   :  { %2480 = sst [smem:[#allocation35_spill]] %s2448_s7 }
   0x8   :  { %2481 = sst [smem:[#allocation36_spill]] %s2449_s8 }
   0x9   :  { %2482 = sst [smem:[#allocation37_spill]] %s2450_s9 }
   0xa   :  { %2483 = sst [smem:[#allocation38_spill]] %s2451_s10 }
   0xb   :  { %2484 = sst [smem:[#allocation39_spill]] %s2452_s11 }
   0xc   :  { %2485 = sst [smem:[#allocation40_spill]] %s2453_s12 }
   0xd   :  { %2486 = sst [smem:[#allocation41_spill]] %s2454_s13 }
   0xe   :  { %2487 = sst [smem:[#allocation42_spill]] %s2455_s14 }
   0xf   :  { %2488 = sst [smem:[#allocation43_spill]] %s2456_s15 }
  0x10   :  { %2489 = sst [smem:[#allocation44_spill]] %s2457_s16 }
  0x11   :  { %2490 = sst [smem:[#allocation45_spill]] %s2458_s17 }
  0x12   :  { %22 = vsyncpa [#allocation5], 0 }
  0x13   :  { %23 = vsyncpa [#allocation8], 0 }
  0x14   :  { %25 = vsyncpa [#allocation8 + $0x1], 0 }
  0x15   :  { %26 = vsyncpa [#allocation6], 0 }
  0x16   :  { %28 = vsyncpa [#allocation6 + $0x1], 0  ;;  %s2085_s24 = smov 0   ;;  %s2087_s25 = smov 0  }
  0x17   :  { %s2089_s26 = smov 0   ;;  %s2091_s27 = smov 0  }
  0x18   :  { %s2093_s28 = smov 0   ;;  %s2095_s29 = smov 0  }
  0x19   :  { %s2097_s0 = smov 0   ;;  %s2099_s30 = smov 0  }
  0x1a   :  { %s2101_s18 = smov 0   ;;  %s2103_s19 = smov 0  }
  0x1b   :  { %s2105_s1 = smov 0  }
  0x1c LB: > { %2491 = sst [smem:[#allocation13_spill]] %s1943_s24  ;;  %s1556_s20 = sadd.s32 4294967295, %s1983_s1   ;;  %s1983_s1 = sphi %s2105_s1, %s34_s1   ;;  %s1979_s19 = sphi %s2103_s19, %s2558_s19   ;;  %s1975_s18 = sphi %s2101_s18, %s2557_s18   ;;  %s1971_s30 = sphi %s2099_s30, %s2556_s30   ;;  %s1967_s0 = sphi %s2097_s0, %s2555_s0   ;;  %s1963_s29 = sphi %s2095_s29, %s2554_s29   ;;  %s1959_s28 = sphi %s2093_s28, %s2553_s28   ;;  %s1955_s27 = sphi %s2091_s27, %s2552_s27   ;;  %s1951_s26 = sphi %s2089_s26, %s2551_s26   ;;  %s1947_s25 = sphi %s2087_s25, %s2560_s25   ;;  %s1943_s24 = sphi %s2085_s24, %s2559_s24  }
  0x1d   : > { %2492 = sst [smem:[#allocation14_spill]] %s1951_s26  ;;  %s1557_s21 = sadd.s32 4294967294, %s1983_s1  }
  0x1e   : > { %2493 = sst [smem:[#allocation15_spill]] %s1959_s28  ;;  %p446_p0 = scmp.ne.s32.totalorder %s1959_s28, %s1955_s27 }
  0x1f   : > { %2494 = sst [smem:[#allocation16_spill]] %s1963_s29  ;;  %p2141_p1 = scmp.eq.s32.totalorder %s1556_s20, 0 }
  0x20   : > { %2495 = sst [smem:[#allocation17_spill]] %s1971_s30  ;;  %p495_p2 = scmp.ne.s32.totalorder %s1951_s26, %s1947_s25 }
  0x21   : > { %2496 = sst [smem:[#allocation18_spill]] %s1975_s18  ;;  %p2149_p3 = por %p2141_p1, %p446_p0 }
  0x22   : > { %2497 = sst [smem:[#allocation19_spill]] %s1979_s19  ;;  %p496_p4 = scmp.eq.s32.totalorder %s1556_s20, 3 }
  0x23   : > { %2498 = sst [smem:[#allocation20_spill]] %s1983_s1  ;;  %p501_p5 = scmp.ne.s32.totalorder %s1947_s25, %s1943_s24 }
  0x24   : > { %p502_p6 = scmp.eq.s32.totalorder %s1557_s21, 3  ;;  %p2155_p7 = por %p496_p4, %p495_p2 }
  0x25   : > { %p1558_p8 = scmp.ge.s32.totalorder %s1983_s1, 1  ;;  %p509_p10 = scmp.lt.s32.totalorder %s1983_s1, 5 }
  0x26   : > { %s2501_s17 = scalar_select %p2155_p7, 1, 0 }
  0x27   : > { %p2160_p9 = por %p502_p6, %p501_p5  ;;  %s2505_s4 = sld [smem:[#allocation33_spill]] }
  0x28   : > { %2502 = sst [smem:[#allocation21_spill]] %s2501_s17  ;;  %p2168_p11 = pnand %p1558_p8, %p509_p10 }
  0x29   : > { %s2503_s27 = scalar_select %p2160_p9, 1, 0 }
  0x2a   : > { %p1648_p12 = pneg %p2168_p11  ;;  %s1985_s24 = smov [#allocation4]  }
  0x2b   : > { %2504 = sst [smem:[#allocation22_spill]] %s2503_s27  ;;  %s526_s17 = sshll.u32 %s1985_s24, 4  ;;  %s527_s17 = int_to_ptr.vmem [resolvable:$true] %s526_s17 }
  0x2c   : > { %p1649_p13 = pnand %p1648_p12, %p2141_p1  ;;  %s43_s3 = sadd.s32 1, %s1975_s18 }
  0x2d   : > { %s524_s20 = sshll.u32 %s2505_s4, 4  ;;  %p44_p0 = scmp.ge.s32.totalorder %s43_s3, 2  ;;  %s525_s20 = int_to_ptr.hbm [resolvable:$true] %s524_s20 }
  0x2e   : > { %1651 = dma.hbm_to_vmem [thread:$0]  (!%p1649_p13), %s525_s20, 16, %s527_s17, [#allocation5]  }
  0x2f   : > { %s46_s16 = sadd.s32 1, %s1979_s19  ;;  %s433_s4 = sadd.s32 1, %s1963_s29 }
  0x30   : > { %p440_p2 = scmp.ne.s32.totalorder %s1963_s29, %s1959_s28  ;;  %s2562_s3 = smov (%p44_p0, %s43_s3), 0 }
  0x31   : > { %2507 = sst [smem:[#allocation23_spill]] %s2562_s3  ;;  %s2564_s16 = smov (!%p44_p0, %s46_s16), %s1979_s19 }
  0x32   : > { %s430_s24 = ssub.s32 %s1975_s18, %s2562_s3  ;;  %p441_p4 = scmp.eq.s32.totalorder %s1983_s1, 0 }
  0x33   : > { %p48_p5 = scmp.ge.s32.totalorder %s2564_s16, 2  ;;  %p431_p6 = scmp.eq.s32.totalorder %s430_s24, 0 }
  0x34   : > { %s485_s27 = sadd.s32 1, %s1951_s26  ;;  %p2188_p8 = por %p441_p4, %p440_p2 }
  0x35   : > { %s2566_s16 = smov (%p48_p5, %s2564_s16), 0  ;;  %s625_s13 = sand.u32 1, %s1963_s29  }
  0x36   : > { %2509 = sst [smem:[#allocation24_spill]] %s2566_s16  ;;  %s482_s14 = ssub.s32 %s1979_s19, %s2566_s16 }
  0x37   : > { %s2195_s20 = scalar_select %p431_p6, %s1963_s29, %s433_s4  }
  0x38   : > { %p483_p10 = scmp.eq.s32.totalorder %s482_s14, 0  ;;  %p1661_p12 = scmp.lt.s32.totalorder %s1983_s1, 4 }
  0x39   : > { %2510 = sst [smem:[#allocation25_spill]] %s2195_s20  ;;  %s628_s9 = scalar_lea.vmem [#allocation7], %s625_s13 }
  0x3a   : > { %s2511_s15 = sld [smem:[#allocation43_spill]]  ;;  %s635_s8 = sshll.u32 %s628_s9, 4  ;;  %s636_s8 = int_to_ptr.vmem [resolvable:$true] %s635_s8 }
  0x3b   : > { %s2206_s24 = scalar_select %p483_p10, %s1951_s26, %s485_s27  }
  0x3c   : > { %p1653_p13 = pnand %p1661_p12, %p2188_p8  ;;  %s626_s7 = scalar_lea.sflag [#allocation8], %s625_s13 }
  0x3d   : > { %2512 = sst [smem:[#allocation26_spill]] %s2206_s24 }
  0x3e   : > { %650 = sbr.rel (%p2168_p11) target bundleno = 2436 (0x984), region = 88 }
  0x40   : > { %s631_s11 = scalar_lea.hbm %s2511_s15, %s1975_s18 }
  0x41   : > { %s633_s10 = sshll.u32 %s631_s11, 4  ;;  %s634_s10 = int_to_ptr.hbm [resolvable:$true] %s633_s10 }
  0x42   : > { %1655 = dma.hbm_to_vmem [thread:$0]  (!%p1653_p13), %s634_s10, 16, %s636_s8, %s626_s7  }
  0x43   : > { %1930 = dma.done.wait (%p2141_p1), [#allocation5], 16  }
  0x44   : > { %1932 = vsyncadd (%p2141_p1), [#allocation5], 4294967280  ;;  %s657_s4 = sand.u32 1, %s1959_s28  }
  0x45   : > { %s658_s11 = scalar_lea.sflag [#allocation8], %s657_s4  ;;  %s2217_s9 = scalar_lea.vmem [#allocation7], %s657_s4 }
  0x46   : > { %2513 = sst [smem:[#allocation27_spill]] %s2217_s9 }
  0x47   : > { %1934 = dma.done.wait (%p2149_p3), %s658_s11, 16  }
  0x48   : > { %1936 = vsyncadd (%p2149_p3), %s658_s11, 4294967280  ;;  %p762_p11 = scmp.lt.s32.totalorder %s1971_s30, 1  ;;  %p773_p0 = scmp.lt.s32.totalorder %s1967_s0, 1 }
  0x49   : > { %s2515_s3 = sld [smem:[#allocation29_spill]]  ;;  %s2528_s9 = sand.u32 1, %s1947_s25  }
  0x4a   : > { %s2227_s8 = scalar_select %p762_p11, %s1971_s30, 1 }
  0x4b   : > { %s2230_s10 = scalar_select %p773_p0, %s1967_s0, 1 }
  0x4c   : > { %s1563_s12 = sshll.u32 %s2227_s8, 3  ;;  %s2516_s2 = sld [smem:[#allocation31_spill]] }
  0x4d   : > { %s1626_s15 = sshll.u32 %s2230_s10, 4  ;;  %s2518_s5 = sld [smem:[#allocation34_spill]] }
  0x4e   : > { %s2519_s27 = sld [smem:[#allocation35_spill]]  ;;  %s1629_s20 = sshll.u32 %s2230_s10, 5 }
  0x4f   : > { %s765_s17 = scalar_lea.vmem %s2515_s3, %s1563_s12  ;;  %s2521_s28 = sld [smem:[#allocation37_spill]] }
  0x50   : > { %s2523_s1 = sld [smem:[#allocation39_spill]]  ;;  %p1573_p1 = scmp.ne.s32.totalorder %s1967_s0, 0 }
  0x51   : > { %s2524_s30 = sld [smem:[#allocation40_spill]] }
  0x52   : > { %s2243_s7 = scalar_lea.vmem %s2516_s2, %s1563_s12  ;;  %s2525_s12 = sld [smem:[#allocation41_spill]] }
  0x53   : > { %2517 = sst [smem:[#allocation28_spill]] %s2243_s7  ;;  %s2253_s13 = scalar_lea.vmem %s2518_s5, %s1626_s15 }
  0x54   : > { %s2258_s21 = scalar_lea.vmem %s2519_s27, %s1626_s15  ;;  %s2526_s11 = sld [smem:[#allocation42_spill]] }
  0x55   : > { %s2267_s24 = scalar_lea.vmem %s2521_s28, %s1626_s15  ;;  %s2527_s16 = sld [smem:[#allocation44_spill]] }
  0x56   : > { %s2277_s14 = scalar_lea.vmem %s2523_s1, %s1629_s20  ;;  %s2297_s5 = scalar_lea.vmem [#allocation9], %s2528_s9 }
  0x57   : > { %s804_s23 = scalar_lea.vmem %s2524_s30, %s2230_s10  ;;  %818 = sbr.rel (%p1573_p1) target bundleno = 364 (0x16c), region = 100 }
  0x58   : > { %s807_s2 = scalar_lea.vmem %s2525_s12, %s2230_s10  ;;  %s2529_s1 = sld [smem:[#allocation32_spill]] (!%p1573_p1) }
  0x5a   : > { %s810_s7 = scalar_lea.vmem %s2526_s11, %s2230_s10 }
  0x5b   : > { %s813_s29 = scalar_lea.vmem %s2527_s16, %s2230_s10 }
  0x5c   : > { %v819_v0 = vld [vmem:[%s765_s17] sm:$0xff]  ;;  %vm822_vm0 = vcmask 261120   ;;  %v1986_v2 = vmov 32.0   ;;  %v1763_v25 = vld [vmem:[#allocation4] ss:$0 sm:$0xff]  ;;  %vm862_vm5 = vcmask 257024  }
  0x5d   : > { %v823_v1 = vsel %vm822_vm0, %v819_v0, 0.0  ;;  %1764 = vrcp.f32 %v1986_v2 }
  0x5e   : > { %824 = vadd.xlane.f32.xlu0 %v823_v1  ;;  %v1762_v23 = vld [vmem:[%s2529_s1] ss:$0 sm:$0xff] }
  0x63   : > { %v1765_v3 = vpop.eup %1764 }
  0x64   : > { %v827_v4 = vmul.f32 32.0, %v1765_v3  ;;  %vm831_vm1 = vweird.f32 %v1765_v3 }
  0x66   : > { %v828_v5 = vsub.f32 1.0, %v827_v4 }
  0x68   : > { %v829_v6 = vmul.f32 %v1765_v3, %v828_v5 }
  0x6a   : > { %v830_v7 = vadd.f32 %v1765_v3, %v829_v6 }
  0x6c   : > { %v832_v8 = vsel %vm831_vm1, %v1765_v3, %v830_v7 }
  0xd1   : > { %v825_v9 = vpop.xlane.xlu0 %824 }
  0xd2   : > { %v833_v10 = vmul.f32 %v832_v8, %v825_v9 }
  0xd4   : > { %v834_v11 = vsub.f32 %v819_v0, %v833_v10 }
  0xd6   : > { %v835_v12 = vmul.f32 %v834_v11, %v834_v11 }
  0xd8   : > { %v836_v13 = vsel %vm822_vm0, %v835_v12, 0.0 }
  0xd9   : > { %837 = vadd.xlane.f32.xlu0 %v836_v13 }
 0x14c   : > { %v838_v14 = vpop.xlane.xlu0 %837 }
 0x14d   : > { %v839_v15 = vmul.f32 %v838_v14, %v832_v8 }
 0x14f   : > { %v840_v16 = vadd.f32 1e-12, %v839_v15 }
 0x151   : > { %1766 = vrsqrt.f32 %v840_v16  ;;  %vm847_vm3 = vweird.f32 %v840_v16 }
 0x157   : > { %v1767_v17 = vpop.eup %1766 }
 0x158   : > { %v842_v18 = vmul.f32 %v1767_v17, %v840_v16  ;;  %vm848_vm2 = vweird.f32 %v1767_v17 }
 0x159   : > { %vm849_vm4 = vmor %vm847_vm3, %vm848_vm2 }
 0x15a   : > { %v843_v19 = vmul.f32 %v1767_v17, %v842_v18 }
 0x15c   : > { %v844_v20 = vmul.f32 0.5, %v843_v19 }
 0x15e   : > { %v845_v21 = vsub.f32 1.5, %v844_v20 }
 0x160   : > { %v846_v22 = vmul.f32 %v1767_v17, %v845_v21 }
 0x162   : > { %v850_v24 = vsel %vm849_vm4, %v1767_v17, %v846_v22 }
 0x163   : > { %v851_v26 = vmul.f32 %v850_v24, %v834_v11 }
 0x165   : > { %v855_v27 = vmul.f32 %v1762_v23, %v851_v26 }
 0x167   : > { %v859_v28 = vadd.f32 %v1763_v25, %v855_v27 }
 0x169   : > { %860 = vst.msk [vmem:[#allocation2] sm:$0xff] %vm822_vm0, %v859_v28  ;;  %v861_v29 = vpack.c.bf16 %v859_v28, %v859_v28 }
 0x16b   : > { %863 = vst.msk [vmem:[#allocation3] sm:$0xf] %vm862_vm5, %v861_v29 }
 0x16c PF: > { %v1631_v30 = vld [vmem:[%s2253_s13 + $0x8] sm:$0xff]  ;;  %v1630_v31 = vld [vmem:[%s2253_s13] sm:$0xff]  ;;  %vm905_vm6 = vcmask 261120   ;;  %s2530_s12 = scalar_lea.vmem %s2447_s6, %s2230_s10  ;;  %s1987_s20 = smov 80   ;;  %vm928_vm7 = vcmask 130048   ;;  %vm971_vm8 = vcmask 1043456  }
 0x16d   : > { %915 = vmatpush.bf16.msra.mxu0 %v1631_v30  ;;  %v1768_v33 = vld [vmem:[%s2530_s12] ss:$0 sm:$0xff]  ;;  %s1988_s13 = smov 112   ;;  %s1989_s22 = smov 64   ;;  %v1992_v50 = vmov -1e+09  }
 0x16e   : > { %s1990_s27 = smov 96   ;;  %s1991_s3 = smov 48   ;;  %vm953_vm10 = vcmask 64512   ;;  %v1632_v17 = vld [vmem:[%s2258_s21] sm:$0xff]  ;;  %v1633_v18 = vld [vmem:[%s2258_s21 + $0x8] sm:$0xff]  ;;  %vm1208_vm15 = vcmask 523264  }
 0x16f   : > { %s2531_s28 = sld [smem:[#allocation30_spill]]  ;;  %vm1260_vm3 = vcmask 257024   ;;  %p1623_p3 = scmp.ne.s32.totalorder %s1967_s0, 1 }
 0x170   : > { %s2533_s18 = sld [smem:[#allocation36_spill]]  ;;  %v867_v30 = vld [vmem:[#allocation2] sm:$0xff] }
 0x171   : > { %916 = vmatpush.bf16.msra.mxu0 %v1630_v31  ;;  %s2537_s12 = sld [smem:[#allocation38_spill]] }
 0x172   : > { %v868_v32 = vld [vmem:[#allocation3] sm:$0xf]  ;;  %s2542_s4 = sld [smem:[#allocation28_spill]] (!%p1623_p3) }
 0x174   : > { %1582 = vmatmul.msk.bf16.vlgmr.msra.gmra.mxu0 %vm905_vm6, %v868_v32 }
 0x175   : > { %s2532_s11 = scalar_lea.vmem %s2531_s28, %s2227_s8  ;;  %1064 = vmatpush.bf16.msrb.mxu0 %v1633_v18 }
 0x176   : > { %v864_v49 = vld [vmem:[%s2532_s11] sm:$0x1]  ;;  %s2534_s16 = scalar_lea.vmem %s2533_s18, %s2230_s10 }
 0x177   : > { %vm865_vm9 = vcmp.gt.f32.partialorder %v864_v49, 0.5  ;;  %v1769_v27 = vld [vmem:[%s2534_s16] ss:$0 sm:$0xff] }
 0x178   : > { %v866_v51 = vsel %vm865_vm9, 0.0, %v1992_v50 }
 0x179   : > { %v950_v52 = vperm.slane %v866_v51, 0 }
 0x1f1   : > { %v918_v34 = vpop.f32.mrf.mxu0 }
 0x1f2   : > { %v919_v35 = vadd.f32 %v1768_v33, %v918_v34 }
 0x1f4   : > { %v922_v36 = vpack.c.bf16 %v919_v35, %v919_v35  ;;  %v1993_v35 = vmov 32.0  }
 0x1f6   : > { %v924_v37 = vunpack.c.l.b16 %v922_v36 }
 0x1f8   : > { %v925_v38 = vpack.c.b16 %v924_v37, %v924_v37 }
 0x1f9   : > { %v920_v39 = vpop.f32.mrf.mxu0 }
 0x1fa   : > { %989 = vrot.lane.b32.xlu1 %v925_v38, %s1987_s20  ;;  %926 = vrot.lane.b32.xlu0 %v925_v38, %s1988_s13  ;;  %s2538_s20 = scalar_lea.vmem %s2537_s12, %s2230_s10 }
 0x202   : > { %991 = vrot.lane.b32.xlu0 %v925_v38, %s1989_s22  ;;  %s2540_s22 = sld [smem:[#allocation27_spill]] }
 0x20a   : > { %966 = vrot.lane.b32.xlu0 %v925_v38, %s1990_s27 }
 0x212   : > { %1026 = vrot.lane.b32.xlu0 %v925_v38, %s1991_s3 }
 0x26c   : > { %v927_v40 = vpop.permute.xlu0 %926  ;;  %v990_v44 = vpop.permute.xlu1 %989 }
 0x26d   : > { %v933_v41 = vsel %vm928_vm7, %v927_v40, 0 }
 0x26e   : > { %942 = vmatpush.bf16.xpose.msra.mxu1 %v933_v41 }
 0x274   : > { %v992_v42 = vpop.permute.xlu0 %991 }
 0x275   : > { %1583 = vmatmul.msk.bf16.vlgmr.msra.gmra.mxu1 %vm928_vm7, %v922_v36  ;;  %v997_v43 = vsel %vm928_vm7, %v992_v42, 0 }
 0x276   : > { %1006 = vmatpush.bf16.xpose.msra.mxu3 %v997_v43  ;;  %1086 = vmatpush.bf16.msrb.mxu1 %v1632_v17 }
 0x27c   : > { %v967_v45 = vpop.permute.xlu0 %966 }
 0x27d   : > { %1585 = vmatmul.msk.bf16.vlgmr.msra.gmra.mxu3 %vm928_vm7, %v990_v44  ;;  %v973_v46 = vsel %vm971_vm8, %v967_v45, 0 }
 0x27e   : > { %982 = vmatpush.bf16.msra.mxu2 %v973_v46 }
 0x284   : > { %v1027_v47 = vpop.permute.xlu0 %1026 }
 0x285   : > { %v1032_v48 = vsel %vm971_vm8, %v1027_v47, 0  ;;  %v1635_v47 = vld [vmem:[%s2267_s24 + $0x8] sm:$0xff] }
 0x286   : > { %1041 = vmatpush.bf16.msrb.mxu2 %v1032_v48  ;;  %1163 = vmatpush.bf16.msrb.mxu3 %v1635_v47  ;;  %v1634_v48 = vld [vmem:[%s2267_s24] sm:$0xff] }
 0x28a   : > { %1164 = vmatpush.bf16.msrb.mxu3 %v1634_v48 }
 0x2f2   : > { %v944_v53 = vpop.f32.mrf.mxu1 }
 0x2f3   : > { %v948_v54 = vmul.f32 0.25, %v944_v53 }
 0x2f5   : > { %v952_v55 = vadd.f32 %v950_v52, %v948_v54 }
 0x2f7   : > { %v954_v56 = vsel %vm953_vm10, %v952_v55, -inf }
 0x2f8   : > { %955 = vmax.xlane.f32.xlu1 %v954_v56 }
 0x2fa   : > { %v946_v57 = vpop.f32.mrf.mxu1 }
 0x300   : > { %v1008_v58 = vpop.f32.mrf.mxu3 }
 0x301   : > { %v1012_v59 = vmul.f32 0.25, %v1008_v58  ;;  %v1770_v58 = vld [vmem:[%s807_s2] ss:$0 sm:$0xff] }
 0x303   : > { %v1013_v60 = vadd.f32 %v1012_v59, %v950_v52 }
 0x305   : > { %v1014_v61 = vsel %vm953_vm10, %v1013_v60, -inf }
 0x306   : > { %1015 = vmax.xlane.f32.xlu2 %v1014_v61  ;;  %v1771_v61 = vld [vmem:[%s810_s7] ss:$0 sm:$0xff] }
 0x308   : > { %v1010_v62 = vpop.f32.mrf.mxu3 }
 0x36b   : > { %v956_v63 = vpop.xlane.xlu1 %955 }
 0x36c   : > { %v957_v0 = vsub.f32 %v952_v55, %v956_v63 }
 0x36e   : > { %v958_v1 = vmul.f32 1.442695, %v957_v0 }
 0x370   : > { %1776 = vpow2.f32 %v958_v1  ;;  %v1639_v1 = vld [vmem:[%s2277_s14 + $0x18] sm:$0xff] }
 0x376   : > { %v1777_v2 = vpop.eup %1776 }
 0x377   : > { %v960_v3 = vsel %vm953_vm10, %v1777_v2, 0.0 }
 0x378   : > { %961 = vadd.xlane.f32.xlu2 %v960_v3  ;;  %v1637_v3 = vld [vmem:[%s2277_s14 + $0x8] sm:$0xff] }
 0x379   : > { %v1016_v4 = vpop.xlane.xlu2 %1015 }
 0x37a   : > { %v1017_v5 = vsub.f32 %v1013_v60, %v1016_v4  ;;  %v1636_v4 = vld [vmem:[%s2277_s14] sm:$0xff] }
 0x37c   : > { %v1018_v6 = vmul.f32 1.442695, %v1017_v5  ;;  %v1772_v5 = vld [vmem:[%s2538_s20] ss:$0 sm:$0xff] }
 0x37e   : > { %1778 = vpow2.f32 %v1018_v6 }
 0x384   : > { %v1779_v7 = vpop.eup %1778 }
 0x385   : > { %v1020_v8 = vsel %vm953_vm10, %v1779_v7, 0.0 }
 0x386   : > { %1021 = vadd.xlane.f32.xlu2 %v1020_v8 }
 0x3eb   : > { %v962_v9 = vpop.xlane.xlu2 %961 }
 0x3ec   : > { %1780 = vrcp.f32 %v962_v9 }
 0x3f2   : > { %v1781_v10 = vpop.eup %1780 }
 0x3f3   : > { %v964_v11 = vmul.f32 %v1781_v10, %v1777_v2  ;;  %v1638_v2 = vld [vmem:[%s2277_s14 + $0x10] sm:$0xff] }
 0x3f5   : > { %v965_v12 = vpack.c.bf16 %v964_v11, %v964_v11 }
 0x3f7   : > { %1584 = vmatmul.msk.bf16.vlgmr.msra.gmra.mxu2 %vm953_vm10, %v965_v12 }
 0x3f8   : > { %1216 = vmatpush.bf16.msra.mxu2 %v1639_v1 }
 0x3f9   : > { %v1022_v13 = vpop.xlane.xlu2 %1021 }
 0x3fa   : > { %1782 = vrcp.f32 %v1022_v13 }
 0x3fb   : > { %1784 = vrcp.f32 %v1993_v35 }
 0x3fc   : > { %1217 = vmatpush.bf16.msra.mxu2 %v1638_v2 }
 0x400   : > { %v1783_v14 = vpop.eup %1782  ;;  %1218 = vmatpush.bf16.msra.mxu2 %v1637_v3 }
 0x401   : > { %v1024_v15 = vmul.f32 %v1783_v14, %v1779_v7  ;;  %v1785_v36 = vpop.eup %1784 }
 0x402   : > { %v1104_v37 = vmul.f32 32.0, %v1785_v36  ;;  %vm1108_vm11 = vweird.f32 %v1785_v36 }
 0x403   : > { %v1025_v16 = vpack.c.bf16 %v1024_v15, %v1024_v15 }
 0x404   : > { %v1105_v38 = vsub.f32 1.0, %v1104_v37  ;;  %1219 = vmatpush.bf16.msra.mxu2 %v1636_v4 }
 0x406   : > { %v1106_v39 = vmul.f32 %v1785_v36, %v1105_v38 }
 0x407   : > { %1586 = vmatmul.msk.bf16.vlgmr.msrb.gmra.mxu2 %vm953_vm10, %v1025_v16 }
 0x408   : > { %v1107_v40 = vadd.f32 %v1785_v36, %v1106_v39  ;;  %v1774_v39 = vld [vmem:[%s2540_s22] ss:$0 sm:$0xff] }
 0x40a   : > { %v2339_v41 = vsel %vm1108_vm11, %v1785_v36, %v1107_v40 }
 0x47a   : > { %v984_v19 = vpop.f32.mrf.mxu2 }
 0x47b   : > { %v988_v20 = vpack.c.bf16 %v984_v19, %v984_v19  ;;  %v1773_v19 = vld [vmem:[%s804_s23] ss:$0 sm:$0xff] }
 0x47d   : > { %1596 = vmatmul.msk.bf16.vlgmr.msrb.gmra.mxu1 %vm928_vm7, %v988_v20 }
 0x482   : > { %v986_v21 = vpop.f32.mrf.mxu2 }
 0x48a   : > { %v1043_v22 = vpop.f32.mrf.mxu2 }
 0x48b   : > { %v1047_v23 = vpack.c.bf16 %v1043_v22, %v1043_v22 }
 0x48d   : > { %1591 = vmatmul.msk.bf16.vlgmr.msrb.gmra.mxu0 %vm928_vm7, %v1047_v23 }
 0x492   : > { %v1045_v24 = vpop.f32.mrf.mxu2 }
 0x4fa   : > { %v1088_v25 = vpop.f32.mrf.mxu1 }
 0x502   : > { %v1090_v26 = vpop.f32.mrf.mxu1 }
 0x50a   : > { %v1066_v28 = vpop.f32.mrf.mxu0 }
 0x50b   : > { %v1089_v29 = vadd.f32 %v1088_v25, %v1066_v28 }
 0x50d   : > { %v1096_v31 = vadd.f32 %v1769_v27, %v1089_v29 }
 0x50f   : > { %v1097_v32 = vadd.f32 %v1096_v31, %v867_v30 }
 0x511   : > { %v1100_v33 = vsel %vm905_vm6, %v1097_v32, 0.0 }
 0x512   : > { %1101 = vadd.xlane.f32.xlu2 %v1100_v33  ;;  %v1068_v34 = vpop.f32.mrf.mxu0 }
 0x585   : > { %v1102_v42 = vpop.xlane.xlu2 %1101 }
 0x586   : > { %v1110_v43 = vmul.f32 %v2339_v41, %v1102_v42  ;;  %v1775_v42 = vld [vmem:[%s813_s29] ss:$0 sm:$0xff] }
 0x588   : > { %v1111_v44 = vsub.f32 %v1097_v32, %v1110_v43 }
 0x58a   : > { %v1112_v45 = vmul.f32 %v1111_v44, %v1111_v44 }
 0x58c   : > { %v1113_v46 = vsel %vm905_vm6, %v1112_v45, 0.0 }
 0x58d   : > { %1114 = vadd.xlane.f32.xlu0 %v1113_v46 }
 0x600   : > { %v1115_v49 = vpop.xlane.xlu0 %1114 }
 0x601   : > { %v1116_v50 = vmul.f32 %v1115_v49, %v2339_v41 }
 0x603   : > { %v1117_v51 = vadd.f32 1e-12, %v1116_v50 }
 0x605   : > { %1786 = vrsqrt.f32 %v1117_v51  ;;  %vm1124_vm13 = vweird.f32 %v1117_v51 }
 0x60b   : > { %v1787_v52 = vpop.eup %1786 }
 0x60c   : > { %v1119_v53 = vmul.f32 %v1787_v52, %v1117_v51  ;;  %vm1125_vm12 = vweird.f32 %v1787_v52 }
 0x60d   : > { %vm1126_vm14 = vmor %vm1124_vm13, %vm1125_vm12 }
 0x60e   : > { %v1120_v54 = vmul.f32 %v1787_v52, %v1119_v53 }
 0x610   : > { %v1121_v55 = vmul.f32 0.5, %v1120_v54 }
 0x612   : > { %v1122_v56 = vsub.f32 1.5, %v1121_v55 }
 0x614   : > { %v1123_v57 = vmul.f32 %v1787_v52, %v1122_v56 }
 0x616   : > { %v1127_v59 = vsel %vm1126_vm14, %v1787_v52, %v1123_v57 }
 0x617   : > { %v1128_v60 = vmul.f32 %v1127_v59, %v1111_v44 }
 0x619   : > { %v1132_v62 = vmul.f32 %v1770_v58, %v1128_v60 }
 0x61b   : > { %v1136_v63 = vadd.f32 %v1771_v61, %v1132_v62 }
 0x61d   : > { %v1137_v0 = vpack.c.bf16 %v1136_v63, %v1136_v63 }
 0x61f   : > { %1605 = vmatmul.msk.bf16.vlgmr.msrb.gmra.mxu3 %vm905_vm6, %v1137_v0 }
 0x6a2   : > { %v1166_v6 = vpop.f32.mrf.mxu3 }
 0x6a3   : > { %v1167_v7 = vadd.f32 %v1772_v5, %v1166_v6 }
 0x6a5   : > { %v1170_v8 = vmul.f32 %v1167_v7, %v1167_v7 }
 0x6a7   : > { %v1171_v9 = vmul.f32 %v1170_v8, %v1167_v7 }
 0x6a9   : > { %v1172_v10 = vmul.f32 0.044715, %v1171_v9 }
 0x6aa   : > { %v1168_v11 = vpop.f32.mrf.mxu3 }
 0x6ab   : > { %v1173_v12 = vadd.f32 %v1172_v10, %v1167_v7 }
 0x6ad   : > { %v1174_v13 = vmul.f32 0.7978846, %v1173_v12 }
 0x6af   : > { %1788 = vtanh.f32 %v1174_v13 }
 0x6b5   : > { %v1789_v14 = vpop.eup %1788 }
 0x6b6   : > { %v1176_v15 = vadd.f32 1.0, %v1789_v14 }
 0x6b8   : > { %v1177_v16 = vmul.f32 0.5, %v1176_v15 }
 0x6ba   : > { %v1178_v17 = vmul.f32 %v1177_v16, %v1167_v7 }
 0x6bc   : > { %v1179_v18 = vpack.c.bf16 %v1178_v17, %v1178_v17 }
 0x6be   : > { %1622 = vmatmul.msk.bf16.vlgmr.msra.gmra.mxu2 %vm1208_vm15, %v1179_v18 }
 0x741   : > { %v1221_v20 = vpop.f32.mrf.mxu2 }
 0x742   : > { %v1222_v21 = vadd.f32 %v1773_v19, %v1221_v20 }
 0x744   : > { %v1225_v22 = vadd.f32 %v1222_v21, %v1136_v63 }
 0x746   : > { %v1228_v23 = vsel %vm905_vm6, %v1225_v22, 0.0 }
 0x747   : > { %1229 = vadd.xlane.f32.xlu2 %v1228_v23 }
 0x749   : > { %v1223_v24 = vpop.f32.mrf.mxu2 }
 0x7ba   : > { %v1230_v25 = vpop.xlane.xlu2 %1229 }
 0x7bb   : > { %v1231_v26 = vmul.f32 %v1230_v25, %v2339_v41 }
 0x7bd   : > { %v1232_v27 = vsub.f32 %v1225_v22, %v1231_v26 }
 0x7bf   : > { %v1233_v28 = vmul.f32 %v1232_v27, %v1232_v27 }
 0x7c1   : > { %v1234_v29 = vsel %vm905_vm6, %v1233_v28, 0.0 }
 0x7c2   : > { %1235 = vadd.xlane.f32.xlu2 %v1234_v29 }
 0x835   : > { %v1236_v30 = vpop.xlane.xlu2 %1235 }
 0x836   : > { %v1237_v31 = vmul.f32 %v1236_v30, %v2339_v41 }
 0x838   : > { %v1238_v32 = vadd.f32 1e-12, %v1237_v31 }
 0x83a   : > { %1790 = vrsqrt.f32 %v1238_v32  ;;  %vm1245_vm1 = vweird.f32 %v1238_v32 }
 0x840   : > { %v1791_v33 = vpop.eup %1790 }
 0x841   : > { %v1240_v34 = vmul.f32 %v1791_v33, %v1238_v32  ;;  %vm1246_vm0 = vweird.f32 %v1791_v33 }
 0x842   : > { %vm1247_vm2 = vmor %vm1245_vm1, %vm1246_vm0 }
 0x843   : > { %v1241_v35 = vmul.f32 %v1791_v33, %v1240_v34 }
 0x845   : > { %v1242_v36 = vmul.f32 0.5, %v1241_v35 }
 0x847   : > { %v1243_v37 = vsub.f32 1.5, %v1242_v36 }
 0x849   : > { %v1244_v38 = vmul.f32 %v1791_v33, %v1243_v37 }
 0x84b   : > { %v1248_v40 = vsel %vm1247_vm2, %v1791_v33, %v1244_v38 }
 0x84c   : > { %v1249_v43 = vmul.f32 %v1248_v40, %v1232_v27 }
 0x84e   : > { %v1253_v41 = vmul.f32 %v1774_v39, %v1249_v43 }
 0x850   : > { %v1257_v44 = vadd.f32 %v1775_v42, %v1253_v41  ;;  %1265 = sbr.rel (%p1623_p3) target bundleno = 2415 (0x96f), region = 104 }
 0x852   : > { %1258 = vst.msk [vmem:[#allocation2] sm:$0xff] %vm905_vm6, %v1257_v44  ;;  %v1259_v45 = vpack.c.bf16 %v1257_v44, %v1257_v44 }
 0x854   : > { %1261 = vst.msk [vmem:[#allocation3] sm:$0xf] %vm1260_vm3, %v1259_v45 }
 0x855   : > { %v1266_v46 = vld [vmem:[%s2542_s4] sm:$0xff]  ;;  %vm1280_vm4 = vcmask 7168   ;;  %v1994_v47 = vmov 0   ;;  %vm1312_vm9 = vcmask 253952  }
 0x856   : > { %1792 = vset.pattern.permute.xlu0 %v1994_v47  ;;  %v1281_v48 = vsel %vm1280_vm4, %v1266_v46, 0.0 }
 0x857   : > { %1269 = vperm.xlu0 %1792, %v1266_v46   ;;  %v1282_v49 = vrot.slane %v1281_v48, 4 }
 0x859   : > { %v1283_v50 = vadd.f32 %v1282_v49, %v1281_v48 }
 0x85b   : > { %v1284_v51 = vrot.slane %v1283_v50, 2 }
 0x85d   : > { %v1285_v52 = vadd.f32 %v1284_v51, %v1283_v50 }
 0x85f   : > { %v1286_v53 = vrot.slane %v1285_v52, 1 }
 0x861   : > { %v1287_v54 = vadd.f32 %v1286_v53, %v1285_v52 }
 0x863   : > { %v1288_v55 = vmax.f32 %v1287_v54, 1.0 }
 0x865   : > { %1793 = vrcp.f32 %v1288_v55 }
 0x86b   : > { %v1794_v56 = vpop.eup %1793 }
 0x86c   : > { %1292 = vperm.xlu0 %1792, %v1794_v56  }
 0x8c9   : > { %v1270_v57 = vpop.permute.xlu0 %1269 }
 0x8ca   : > { %v1272_v58 = vmul.f32 %v1270_v57, %v1257_v44 }
 0x8cc   : > { %v1273_v59 = vsel %vm905_vm6, %v1272_v58, 0.0 }
 0x8cd   : > { %v1274_v60 = vrot.slane %v1273_v59, 4 }
 0x8cf   : > { %v1275_v61 = vadd.f32 %v1274_v60, %v1273_v59 }
 0x8d1   : > { %v1276_v62 = vrot.slane %v1275_v61, 2 }
 0x8d3   : > { %v1277_v63 = vadd.f32 %v1276_v62, %v1275_v61 }
 0x8d5   : > { %v1278_v0 = vrot.slane %v1277_v63, 1 }
 0x8d7   : > { %v1279_v1 = vadd.f32 %v1278_v0, %v1277_v63 }
 0x8de   : > { %v1293_v2 = vpop.permute.xlu0 %1292 }
 0x8df   : > { %v1295_v3 = vmul.f32 %v1293_v2, %v1279_v1 }
 0x8e1   : > { %v1296_v4 = vmul.f32 %v1295_v3, %v1295_v3 }
 0x8e3   : > { %v1297_v5 = vsel %vm905_vm6, %v1296_v4, 0.0 }
 0x8e4   : > { %1298 = vadd.xlane.f32.xlu1 %v1297_v5 }
 0x957   : > { %v1299_v6 = vpop.xlane.xlu1 %1298 }
 0x958   : > { %v1300_v7 = vmax.f32 %v1299_v6, 1e-24 }
 0x95a   : > { %1795 = vrsqrt.f32 %v1300_v7  ;;  %vm1307_vm7 = vweird.f32 %v1300_v7 }
 0x960   : > { %v1796_v8 = vpop.eup %1795 }
 0x961   : > { %v1302_v9 = vmul.f32 %v1796_v8, %v1300_v7  ;;  %vm1308_vm5 = vweird.f32 %v1796_v8 }
 0x962   : > { %vm1309_vm8 = vmor %vm1307_vm7, %vm1308_vm5 }
 0x963   : > { %v1303_v10 = vmul.f32 %v1796_v8, %v1302_v9 }
 0x965   : > { %v1304_v11 = vmul.f32 0.5, %v1303_v10 }
 0x967   : > { %v1305_v12 = vsub.f32 1.5, %v1304_v11 }
 0x969   : > { %v1306_v13 = vmul.f32 %v1796_v8, %v1305_v12 }
 0x96b   : > { %v1310_v14 = vsel %vm1309_vm8, %v1796_v8, %v1306_v13 }
 0x96c   : > { %v1311_v15 = vmul.f32 %v1310_v14, %v1295_v3 }
 0x96e   : > { %1313 = vst.msk [vmem:[%s2297_s5] sm:$0x1] %vm1312_vm9, %v1311_v15 }
 0x96f PF: > { %s2543_s0 = sld [smem:[#allocation17_spill]]  ;;  %s1325_s8 = sshll.u32 %s2297_s5, 4  ;;  %s1326_s8 = int_to_ptr.vmem [resolvable:$true] %s1325_s8 }
 0x970   : > { %s2544_s15 = sld [smem:[#allocation45_spill]]  ;;  %s2546_s18 = sand.u32 1, %s1947_s25  }
 0x971   : > { %s1315_s16 = scalar_lea.sflag [#allocation6], %s2546_s18 }
 0x976   : > { %s1323_s11 = scalar_lea.hbm %s2544_s15, %s2543_s0  ;;  %s1877_s1 = scalar_lea.hbm %s2544_s15, 2 }
 0x977   : > { %s1327_s19 = sshll.u32 %s1323_s11, 4  ;;  %s1328_s19 = int_to_ptr.hbm [resolvable:$true] %s1327_s19 }
 0x978   : > { %s1871_s24 = sshra.s32 %s1328_s19, 4  ;;  %s1872_s24 = int_to_ptr.hbm [resolvable:$true] %s1871_s24 }
 0x979   : > { %s1873_s21 = scalar_lea.hbm %s1872_s24, 1  ;;  %p1878_p6 = scmp.lt.s32.totalorder %s1872_s24, %s2544_s15 }
 0x97a   : > { %p1874_p2 = scmp.ne.s32.totalorder %s1872_s24, %s1873_s21  ;;  %p1879_p8 = scmp.lt.s32.totalorder %s1877_s1, %s1873_s21 }
 0x97c   : > { %p1875_p4 = pnand %p1874_p2, %p2155_p7  ;;  %p1880_p10 = por %p1879_p8, %p1878_p6 }
 0x97e   : > { %p1876_p5 = pneg %p1875_p4 }
 0x980   : > { %p1881_p12 = pnand %p1880_p10, %p1876_p5 }
 0x982   : > { %1884 = shalt.err (!%p1881_p12)
}
 0x983   : > { %1646 = dma.vmem_to_hbm [thread:$0]  (%p2155_p7), %s1326_s8, 16, %s1328_s19, %s1315_s16  }
 0x984 PF: > { %s2547_s5 = sld [smem:[#allocation20_spill]] }
 0x985   : > { %s2548_s17 = sld [smem:[#allocation13_spill]] }
 0x98a   : > { %p1663_p13 = scmp.ge.s32.totalorder %s2547_s5, 2 }
 0x98b   : > { %s1339_s20 = sand.u32 1, %s2548_s17  }
 0x98c   : > { %p1657_p11 = pnand %p1663_p13, %p2160_p9  ;;  %s1340_s7 = scalar_lea.sflag [#allocation6], %s1339_s20 }
 0x98e   : > { %p1658_p0 = pneg %p1657_p11 }
 0x990   : > { %1938 = dma.done.wait (%p1658_p0), %s1340_s7, 16  }
 0x991   : > { %1940 = vsyncadd (%p1658_p0), %s1340_s7, 4294967280  ;;  %s34_s1 = sadd.s32 1, %s2547_s5   ;;  %s2550_s14 = sld [smem:[#allocation14_spill]] }
 0x992   : > { %p31_p1 = scmp.ge.s32.totalorder %s34_s1, 6   ;;  %s2551_s26 = sld [smem:[#allocation26_spill]] }
 0x993   : > { %s2552_s27 = sld [smem:[#allocation15_spill]]  ;;  %s2559_s24 = smov %s1947_s25 }
 0x994   : > { %s2553_s28 = sld [smem:[#allocation16_spill]] }
 0x995   : > { %s2554_s29 = sld [smem:[#allocation25_spill]]  ;;  %33 = sbr.rel (!%p31_p1) target bundleno = 28 (0x1c), region = 188 }
 0x996   : > { %s2555_s0 = sld [smem:[#allocation18_spill]] }
 0x997   : > { %s2556_s30 = sld [smem:[#allocation19_spill]]  ;;  %s2560_s25 = smov %s2550_s14 }
 0x998   : > { %s2557_s18 = sld [smem:[#allocation23_spill]] }
 0x999   : > { %s2558_s19 = sld [smem:[#allocation24_spill]] }
 0x99a   :  { %1345 = vsyncpa [#allocation5], 1 }
 0x99b   :  { %1347 = vsyncpa [#allocation5 + $0x1], 1 }
 0x99c   :  { %1348 = vsyncpa [#allocation8], 1 }
 0x99d   :  { %1350 = vsyncpa [#allocation8 + $0x1], 1 }
 0x99e   :  { %1351 = vsyncpa [#allocation6], 1 }
 0x99f   :  { %1353 = vsyncpa [#allocation6 + $0x1], 1 }

</bundles_post_ra>
